<compile_context>
chip_gen: v5e
topology: v5e:2x2
jax: 0.10.0
libtpu: 0.0.40
codegen_flags: <defaults>
</compile_context>

<pallas_src>
import math
import functools

import numpy as np
import jax
import jax.numpy as jnp
from jax.experimental import pallas as pl
from jax.experimental.pallas import tpu as pltpu

LOG2 = math.log(2.0)

F_IN, HID, LAYERS = 8, 16, 2          # dataset_num_features, hidden_dim, num_gc_layers
E = HID * LAYERS                      # embedding_dim (real)
HID_PAD = 128                         # lane-padded hidden width
E_PAD = LAYERS * HID_PAD              # lane-padded embedding width (per-layer 128 slots)


def _softplus(x):
    # numerically stable softplus matching F.softplus
    return jnp.maximum(x, 0.0) + jnp.log1p(jnp.exp(-jnp.abs(x)))


def _bf16(x):
    return x.astype(jnp.bfloat16)


def _dot(a, b):
    # bf16 MXU operands, f32 accumulation
    return jnp.dot(_bf16(a), _bf16(b), preferred_element_type=jnp.float32)


# ---------------------------------------------------------------------------
# Fused Pallas kernel: whole GcnInfomax forward, emits only the scalar loss.
# ---------------------------------------------------------------------------

def gcn_infomax_kernel(
    a_ref, x_ref, ew1_ref, eb1_ref, ew2_ref, eb2_ref, pool_ref, pmask_ref,
    lw0_ref, lb0_ref, lw1_ref, lb1_ref, lw2_ref, lb2_ref, lws_ref, lbs_ref,
    gw0_ref, gb0_ref, gw1_ref, gb1_ref, gw2_ref, gb2_ref, gws_ref, gbs_ref,
    o_ref, m_ref, *, num_layers, hid_pad, num_nodes, num_graphs,
):
    a = a_ref[...]                          # (N, N)   bf16, A_hat = I + A
    h = x_ref[...]                          # (N, 128) bf16, lane-padded node features

    # ---- Encoder: num_gc_layers x [GINConv(eps=0, MLP=Lin-ReLU-Lin) -> ReLU -> BatchNorm1d] ----
    for l in range(num_layers):
        agg = _dot(a, h)                                              # (I + A) @ x
        t = jnp.maximum(_dot(agg, ew1_ref[l]) + eb1_ref[l], 0.0)
        t = jnp.maximum(_dot(t, ew2_ref[l]) + eb2_ref[l], 0.0)        # F.relu(conv(x))
        # BatchNorm1d (training batch stats, identity affine); one-pass mean / E[x^2]
        mean = jnp.mean(t, axis=0, keepdims=True)
        var = jnp.maximum(jnp.mean(t * t, axis=0, keepdims=True) - mean * mean, 0.0)
        hn = (t - mean) * jax.lax.rsqrt(var + 1e-5)                   # (N, 128) f32
        # "concat": write this layer's block into its 128-aligned column slot of M
        m_ref[:, l * hid_pad:(l + 1) * hid_pad] = hn
        h = _bf16(hn)

    M = m_ref[...]                                                    # (N, L*128) local reps
    y = _dot(pool_ref[...], M)                                        # (G, L*128) global_add_pool

    # ---- FF: relu(relu(relu(zW0+b0)W1+b1)W2+b2) + (zWs+bs) ----
    def ff(z, w0, b0, w1, b1, w2, b2, ws, bs):
        t = jnp.maximum(_dot(z, w0[...]) + b0[...], 0.0)
        t = jnp.maximum(_dot(t, w1[...]) + b1[...], 0.0)
        t = jnp.maximum(_dot(t, w2[...]) + b2[...], 0.0)
        return t + _dot(z, ws[...]) + bs[...]

    l_enc = ff(M, lw0_ref, lb0_ref, lw1_ref, lb1_ref, lw2_ref, lb2_ref, lws_ref, lbs_ref)  # (N,128)
    g_enc = ff(y, gw0_ref, gb0_ref, gw1_ref, gb1_ref, gw2_ref, gb2_ref, gws_ref, gbs_ref)  # (G,128)

    # ---- local_global_loss_ (JSD): res = l_enc @ g_enc.T, transpose folded into dot_general ----
    res = jax.lax.dot_general(
        _bf16(l_enc), _bf16(g_enc),
        dimension_numbers=(((1,), (1,)), ((), ())),
        preferred_element_type=jnp.float32)                           # (N, G)
    pmask = pmask_ref[...]
    pos = res * pmask
    neg = res * (1.0 - pmask)
    e_pos = jnp.sum(LOG2 - _softplus(-pos)) / num_nodes
    e_neg = jnp.sum(_softplus(-neg) + neg - LOG2) / (num_nodes * (num_graphs - 1.0))
    o_ref[0, 0] = e_neg - e_pos


def _flops_estimate(N, G):
    m = 0
    m += LAYERS * (2 * N * N * HID_PAD + 2 * 2 * N * HID_PAD * HID_PAD)      # agg + MLP
    m += 2 * G * N * E_PAD                                                   # pool
    for rows in (N, G):                                                      # FF(M), FF(y)
        m += 2 * 2 * rows * E_PAD * HID_PAD + 2 * 2 * rows * HID_PAD * HID_PAD
    m += 2 * N * G * HID_PAD                                                 # res
    return int(m)


def gcn_infomax_forward(kernel_args, N, G):
    cost = pl.CostEstimate(
        flops=_flops_estimate(N, G),
        transcendentals=int(4 * N * G + LAYERS * HID_PAD),
        bytes_accessed=int(sum(int(np.prod(a.shape)) * a.dtype.itemsize for a in kernel_args) + 4),
    )
    kernel = functools.partial(
        gcn_infomax_kernel, num_layers=LAYERS, hid_pad=HID_PAD,
        num_nodes=float(N), num_graphs=float(G))
    loss = pl.pallas_call(
        kernel,
        out_shape=jax.ShapeDtypeStruct((1, 1), jnp.float32),
        in_specs=[pl.BlockSpec(memory_space=pltpu.MemorySpace.VMEM)] * len(kernel_args),
        out_specs=pl.BlockSpec(memory_space=pltpu.MemorySpace.SMEM),
        scratch_shapes=[pltpu.VMEM((N, E_PAD), jnp.float32)],
        cost_estimate=cost,
    )(*kernel_args)
    return loss[0, 0]


# ---------------------------------------------------------------------------
# Pure-JAX reference.  matmul_dtype=f32 is faithful to the PyTorch module;
# matmul_dtype=bf16 mirrors the kernel's MXU quantization policy.
# ---------------------------------------------------------------------------

def reference_forward(params, a_hat, x, pool_mat, pos_mask, matmul_dtype=jnp.float32):
    def mm(a, b):
        return jnp.dot(a.astype(matmul_dtype), b.astype(matmul_dtype),
                       preferred_element_type=jnp.float32)

    xs = []
    h = x
    for (w1, b1, w2, b2) in params["encoder"]:
        t = jnp.maximum(mm(mm(a_hat, h), w1) + b1, 0.0)
        t = jnp.maximum(mm(t, w2) + b2, 0.0)
        mean = t.mean(0, keepdims=True)
        var = ((t - mean) ** 2).mean(0, keepdims=True)
        h = (t - mean) / jnp.sqrt(var + 1e-5)
        xs.append(h)
    M = jnp.concatenate(xs, 1)
    y = mm(pool_mat, M)

    def ff(z, p):
        w0, b0, w1, b1, w2, b2, ws, bs = p
        t = jnp.maximum(mm(z, w0) + b0, 0.0)
        t = jnp.maximum(mm(t, w1) + b1, 0.0)
        t = jnp.maximum(mm(t, w2) + b2, 0.0)
        return t + mm(z, ws) + bs

    g_enc = ff(y, params["global_d"])
    l_enc = ff(M, params["local_d"])
    res = mm(l_enc, g_enc.T)
    N, G = pos_mask.shape
    pos = res * pos_mask
    neg = res * (1.0 - pos_mask)
    e_pos = jnp.sum(LOG2 - _softplus(-pos)) / N
    e_neg = jnp.sum(_softplus(-neg) + neg - LOG2) / (N * (G - 1))
    return e_neg - e_pos


# ---------------------------------------------------------------------------

if __name__ == "__main__":
    key = jax.random.PRNGKey(0)
    keys = iter(jax.random.split(key, 64))

    def xavier(k, fi, fo):
        a = math.sqrt(6.0 / (fi + fo))
        return jax.random.uniform(k, (fi, fo), jnp.float32, -a, a)

    # ---- f32 parameters (weights xavier_uniform, biases 0 per init_emb) ----
    enc_params = []
    in_dim = F_IN
    for _ in range(LAYERS):
        enc_params.append((xavier(next(keys), in_dim, HID), jnp.zeros((1, HID), jnp.float32),
                           xavier(next(keys), HID, HID), jnp.zeros((1, HID), jnp.float32)))
        in_dim = HID

    def ff_params():
        ps = []
        for _ in range(4):  # 3 block linears + shortcut, all (E, E)
            ps.append(xavier(next(keys), E, E))
            ps.append(jnp.zeros((1, E), jnp.float32))
        return tuple(ps)

    params = {"encoder": enc_params, "local_d": ff_params(), "global_d": ff_params()}

    # ---- deterministic graph data: G graphs, each a bidirectional 4-node ring ----
    NODES_PER_GRAPH, G = 4, 3
    N = NODES_PER_GRAPH * G
    batch = np.repeat(np.arange(G), NODES_PER_GRAPH)
    src, dst = [], []
    for g in range(G):
        base = g * NODES_PER_GRAPH
        for i in range(NODES_PER_GRAPH):
            u, v = base + i, base + (i + 1) % NODES_PER_GRAPH
            src += [u, v]; dst += [v, u]
    a_hat_np = np.eye(N, dtype=np.float32)                 # self term (eps = 0)
    for s, d in zip(src, dst):
        a_hat_np[d, s] += 1.0                              # sum aggregation j -> i
    pos_mask_np = np.zeros((N, G), dtype=np.float32)
    pos_mask_np[np.arange(N), batch] = 1.0

    x = jax.random.normal(next(keys), (N, F_IN), jnp.float32)
    a_hat = jnp.asarray(a_hat_np)
    pos_mask = jnp.asarray(pos_mask_np)
    pool_mat = pos_mask.T                                  # (G, N)

    # ---- lane-padded (HID->128, per-layer 128 slots) bf16 kernel operands ----
    def pad_to(arr, shape):
        out = np.zeros(shape, np.float32)
        a_np = np.asarray(arr)
        out[:a_np.shape[0], :a_np.shape[1]] = a_np
        return out

    def pad_ff_in(w):            # (E, E) -> (E_PAD, HID_PAD), per-layer 128-aligned row slots
        out = np.zeros((E_PAD, HID_PAD), np.float32)
        w_np = np.asarray(w)
        for l in range(LAYERS):
            out[l * HID_PAD:l * HID_PAD + HID, :E] = w_np[l * HID:(l + 1) * HID, :]
        return out

    def pad_ff(p):
        w0, b0, w1, b1, w2, b2, ws, bs = p
        return (jnp.asarray(pad_ff_in(w0), jnp.bfloat16), jnp.asarray(pad_to(b0, (1, HID_PAD))),
                jnp.asarray(pad_to(w1, (HID_PAD, HID_PAD)), jnp.bfloat16), jnp.asarray(pad_to(b1, (1, HID_PAD))),
                jnp.asarray(pad_to(w2, (HID_PAD, HID_PAD)), jnp.bfloat16), jnp.asarray(pad_to(b2, (1, HID_PAD))),
                jnp.asarray(pad_ff_in(ws), jnp.bfloat16), jnp.asarray(pad_to(bs, (1, HID_PAD))))

    ew1 = jnp.asarray(np.stack([pad_to(w1, (HID_PAD, HID_PAD)) for (w1, _, _, _) in enc_params]), jnp.bfloat16)
    eb1 = jnp.asarray(np.stack([pad_to(b1, (1, HID_PAD)) for (_, b1, _, _) in enc_params]))
    ew2 = jnp.asarray(np.stack([pad_to(w2, (HID_PAD, HID_PAD)) for (_, _, w2, _) in enc_params]), jnp.bfloat16)
    eb2 = jnp.asarray(np.stack([pad_to(b2, (1, HID_PAD)) for (_, _, _, b2) in enc_params]))

    kernel_args = (
        jnp.asarray(a_hat, jnp.bfloat16),                  # 0/1/2 entries -> exact in bf16
        jnp.asarray(pad_to(x, (N, HID_PAD)), jnp.bfloat16),
        ew1, eb1, ew2, eb2,
        jnp.asarray(pool_mat, jnp.bfloat16),
        pos_mask,
        *pad_ff(params["local_d"]),
        *pad_ff(params["global_d"]),
    )

    loss = jax.block_until_ready(gcn_infomax_forward(kernel_args, N, G))

    ref_bf16 = jax.block_until_ready(
        reference_forward(params, a_hat, x, pool_mat, pos_mask, matmul_dtype=jnp.bfloat16))
    ref_f32 = jax.block_until_ready(
        reference_forward(params, a_hat, x, pool_mat, pos_mask, matmul_dtype=jnp.float32))

    loss_np = np.asarray(loss)
    assert np.isfinite(loss_np), loss_np
    # kernel vs. reference using the same bf16-MXU quantization policy (tight)
    assert np.allclose(loss_np, np.asarray(ref_bf16), rtol=3e-2, atol=3e-2), (loss_np, np.asarray(ref_bf16))
    # kernel vs. faithful full-f32 reference (bounds the bf16 drift)
    assert np.allclose(loss_np, np.asarray(ref_f32), rtol=1e-1, atol=1e-1), (loss_np, np.asarray(ref_f32))

    print("KERNEL_OK")
</pallas_src>

<mosaic_0001>
module attributes {stable_mosaic.version = 11 : i64} {
  func.func @gcn_infomax_kernel(%arg0: memref<12x12xbf16, #tpu.memory_space<vmem>>, %arg1: memref<12x128xbf16, #tpu.memory_space<vmem>>, %arg2: memref<2x128x128xbf16, #tpu.memory_space<vmem>>, %arg3: memref<2x1x128xf32, #tpu.memory_space<vmem>>, %arg4: memref<2x128x128xbf16, #tpu.memory_space<vmem>>, %arg5: memref<2x1x128xf32, #tpu.memory_space<vmem>>, %arg6: memref<3x12xbf16, #tpu.memory_space<vmem>>, %arg7: memref<12x3xf32, #tpu.memory_space<vmem>>, %arg8: memref<256x128xbf16, #tpu.memory_space<vmem>>, %arg9: memref<1x128xf32, #tpu.memory_space<vmem>>, %arg10: memref<128x128xbf16, #tpu.memory_space<vmem>>, %arg11: memref<1x128xf32, #tpu.memory_space<vmem>>, %arg12: memref<128x128xbf16, #tpu.memory_space<vmem>>, %arg13: memref<1x128xf32, #tpu.memory_space<vmem>>, %arg14: memref<256x128xbf16, #tpu.memory_space<vmem>>, %arg15: memref<1x128xf32, #tpu.memory_space<vmem>>, %arg16: memref<256x128xbf16, #tpu.memory_space<vmem>>, %arg17: memref<1x128xf32, #tpu.memory_space<vmem>>, %arg18: memref<128x128xbf16, #tpu.memory_space<vmem>>, %arg19: memref<1x128xf32, #tpu.memory_space<vmem>>, %arg20: memref<128x128xbf16, #tpu.memory_space<vmem>>, %arg21: memref<1x128xf32, #tpu.memory_space<vmem>>, %arg22: memref<256x128xbf16, #tpu.memory_space<vmem>>, %arg23: memref<1x128xf32, #tpu.memory_space<vmem>>, %arg24: memref<1x1xf32, #tpu.memory_space<smem>>, %arg25: memref<12x256xf32, #tpu.memory_space<vmem>>) attributes {dimension_semantics = [], scalar_prefetch = 0 : i64, scratch_operands = 1 : i64, tpu.core_type = #tpu.core_type<tc>} {
    %c0 = arith.constant 0 : index
    %c0_0 = arith.constant 0 : index
    %0 = vector.load %arg0[%c0, %c0_0] : memref<12x12xbf16, #tpu.memory_space<vmem>>, vector<12x12xbf16>
    %c0_1 = arith.constant 0 : index
    %c0_2 = arith.constant 0 : index
    %1 = vector.load %arg1[%c0_1, %c0_2] : memref<12x128xbf16, #tpu.memory_space<vmem>>, vector<12x128xbf16>
    %cst = arith.constant dense<0.000000e+00> : vector<12x128xf32>
    %2 = tpu.matmul %0, %1, %cst {dimension_numbers = #tpu.dot_dimension_numbers<[1], [0], [0], [1], [0, 0, 1, 1], [], []>} : vector<12x12xbf16>, vector<12x128xbf16>, vector<12x128xf32> -> vector<12x128xf32>
    %c0_3 = arith.constant 0 : index
    %c0_4 = arith.constant 0 : index
    %c0_5 = arith.constant 0 : index
    %3 = vector.load %arg2[%c0_3, %c0_4, %c0_5] : memref<2x128x128xbf16, #tpu.memory_space<vmem>>, vector<1x128x128xbf16>
    %4 = vector.shape_cast %3 : vector<1x128x128xbf16> to vector<128x128xbf16>
    %5 = arith.truncf %2 : vector<12x128xf32> to vector<12x128xbf16>
    %cst_6 = arith.constant dense<0.000000e+00> : vector<12x128xf32>
    %6 = tpu.matmul %5, %4, %cst_6 {dimension_numbers = #tpu.dot_dimension_numbers<[1], [0], [0], [1], [0, 0, 1, 1], [], []>} : vector<12x128xbf16>, vector<128x128xbf16>, vector<12x128xf32> -> vector<12x128xf32>
    %c0_7 = arith.constant 0 : index
    %c0_8 = arith.constant 0 : index
    %c0_9 = arith.constant 0 : index
    %7 = vector.load %arg3[%c0_7, %c0_8, %c0_9] : memref<2x1x128xf32, #tpu.memory_space<vmem>>, vector<1x1x128xf32>
    %8 = vector.shape_cast %7 : vector<1x1x128xf32> to vector<1x128xf32>
    %9 = vector.broadcast %8 : vector<1x128xf32> to vector<12x128xf32>
    %10 = arith.addf %6, %9 : vector<12x128xf32>
    %cst_10 = arith.constant 0.000000e+00 : f32
    %11 = vector.broadcast %cst_10 : f32 to vector<12x128xf32>
    %12 = arith.maximumf %10, %11 : vector<12x128xf32>
    %c0_11 = arith.constant 0 : index
    %c0_12 = arith.constant 0 : index
    %c0_13 = arith.constant 0 : index
    %13 = vector.load %arg4[%c0_11, %c0_12, %c0_13] : memref<2x128x128xbf16, #tpu.memory_space<vmem>>, vector<1x128x128xbf16>
    %14 = vector.shape_cast %13 : vector<1x128x128xbf16> to vector<128x128xbf16>
    %15 = arith.truncf %12 : vector<12x128xf32> to vector<12x128xbf16>
    %cst_14 = arith.constant dense<0.000000e+00> : vector<12x128xf32>
    %16 = tpu.matmul %15, %14, %cst_14 {dimension_numbers = #tpu.dot_dimension_numbers<[1], [0], [0], [1], [0, 0, 1, 1], [], []>} : vector<12x128xbf16>, vector<128x128xbf16>, vector<12x128xf32> -> vector<12x128xf32>
    %c0_15 = arith.constant 0 : index
    %c0_16 = arith.constant 0 : index
    %c0_17 = arith.constant 0 : index
    %17 = vector.load %arg5[%c0_15, %c0_16, %c0_17] : memref<2x1x128xf32, #tpu.memory_space<vmem>>, vector<1x1x128xf32>
    %18 = vector.shape_cast %17 : vector<1x1x128xf32> to vector<1x128xf32>
    %19 = vector.broadcast %18 : vector<1x128xf32> to vector<12x128xf32>
    %20 = arith.addf %16, %19 : vector<12x128xf32>
    %cst_18 = arith.constant 0.000000e+00 : f32
    %21 = vector.broadcast %cst_18 : f32 to vector<12x128xf32>
    %22 = arith.maximumf %20, %21 : vector<12x128xf32>
    %cst_19 = arith.constant dense<0.000000e+00> : vector<128xf32>
    %23 = vector.multi_reduction <add>, %22, %cst_19 [0] : vector<12x128xf32> to vector<128xf32>
    %24 = vector.shape_cast %23 : vector<128xf32> to vector<1x128xf32>
    %cst_20 = arith.constant 1.200000e+01 : f32
    %25 = vector.broadcast %cst_20 : f32 to vector<1x128xf32>
    %26 = arith.divf %24, %25 : vector<1x128xf32>
    %27 = arith.mulf %22, %22 : vector<12x128xf32>
    %cst_21 = arith.constant dense<0.000000e+00> : vector<128xf32>
    %28 = vector.multi_reduction <add>, %27, %cst_21 [0] : vector<12x128xf32> to vector<128xf32>
    %29 = vector.shape_cast %28 : vector<128xf32> to vector<1x128xf32>
    %cst_22 = arith.constant 1.200000e+01 : f32
    %30 = vector.broadcast %cst_22 : f32 to vector<1x128xf32>
    %31 = arith.divf %29, %30 : vector<1x128xf32>
    %32 = arith.mulf %26, %26 : vector<1x128xf32>
    %33 = arith.subf %31, %32 : vector<1x128xf32>
    %cst_23 = arith.constant 0.000000e+00 : f32
    %34 = vector.broadcast %cst_23 : f32 to vector<1x128xf32>
    %35 = arith.maximumf %33, %34 : vector<1x128xf32>
    %36 = vector.broadcast %26 : vector<1x128xf32> to vector<12x128xf32>
    %37 = arith.subf %22, %36 : vector<12x128xf32>
    %cst_24 = arith.constant 9.99999974E-6 : f32
    %38 = vector.broadcast %cst_24 : f32 to vector<1x128xf32>
    %39 = arith.addf %35, %38 : vector<1x128xf32>
    %40 = math.rsqrt %39 : vector<1x128xf32>
    %41 = vector.broadcast %40 : vector<1x128xf32> to vector<12x128xf32>
    %42 = arith.mulf %37, %41 : vector<12x128xf32>
    %c0_25 = arith.constant 0 : index
    %c0_26 = arith.constant 0 : index
    %43 = vector.load %arg25[%c0_25, %c0_26] : memref<12x256xf32, #tpu.memory_space<vmem>>, vector<12x128xf32>
    tpu.vector_store %arg25[%c0_25, %c0_26], %42 {strides = array<i32>} : memref<12x256xf32, #tpu.memory_space<vmem>>, vector<12x128xf32>,
    %44 = arith.truncf %42 : vector<12x128xf32> to vector<12x128xbf16>
    %cst_27 = arith.constant dense<0.000000e+00> : vector<12x128xf32>
    %45 = tpu.matmul %0, %44, %cst_27 {dimension_numbers = #tpu.dot_dimension_numbers<[1], [0], [0], [1], [0, 0, 1, 1], [], []>} : vector<12x12xbf16>, vector<12x128xbf16>, vector<12x128xf32> -> vector<12x128xf32>
    %c1 = arith.constant 1 : index
    %c0_28 = arith.constant 0 : index
    %c0_29 = arith.constant 0 : index
    %46 = vector.load %arg2[%c1, %c0_28, %c0_29] : memref<2x128x128xbf16, #tpu.memory_space<vmem>>, vector<1x128x128xbf16>
    %47 = vector.shape_cast %46 : vector<1x128x128xbf16> to vector<128x128xbf16>
    %48 = arith.truncf %45 : vector<12x128xf32> to vector<12x128xbf16>
    %cst_30 = arith.constant dense<0.000000e+00> : vector<12x128xf32>
    %49 = tpu.matmul %48, %47, %cst_30 {dimension_numbers = #tpu.dot_dimension_numbers<[1], [0], [0], [1], [0, 0, 1, 1], [], []>} : vector<12x128xbf16>, vector<128x128xbf16>, vector<12x128xf32> -> vector<12x128xf32>
    %c1_31 = arith.constant 1 : index
    %c0_32 = arith.constant 0 : index
    %c0_33 = arith.constant 0 : index
    %50 = vector.load %arg3[%c1_31, %c0_32, %c0_33] : memref<2x1x128xf32, #tpu.memory_space<vmem>>, vector<1x1x128xf32>
    %51 = vector.shape_cast %50 : vector<1x1x128xf32> to vector<1x128xf32>
    %52 = vector.broadcast %51 : vector<1x128xf32> to vector<12x128xf32>
    %53 = arith.addf %49, %52 : vector<12x128xf32>
    %cst_34 = arith.constant 0.000000e+00 : f32
    %54 = vector.broadcast %cst_34 : f32 to vector<12x128xf32>
    %55 = arith.maximumf %53, %54 : vector<12x128xf32>
    %c1_35 = arith.constant 1 : index
    %c0_36 = arith.constant 0 : index
    %c0_37 = arith.constant 0 : index
    %56 = vector.load %arg4[%c1_35, %c0_36, %c0_37] : memref<2x128x128xbf16, #tpu.memory_space<vmem>>, vector<1x128x128xbf16>
    %57 = vector.shape_cast %56 : vector<1x128x128xbf16> to vector<128x128xbf16>
    %58 = arith.truncf %55 : vector<12x128xf32> to vector<12x128xbf16>
    %cst_38 = arith.constant dense<0.000000e+00> : vector<12x128xf32>
    %59 = tpu.matmul %58, %57, %cst_38 {dimension_numbers = #tpu.dot_dimension_numbers<[1], [0], [0], [1], [0, 0, 1, 1], [], []>} : vector<12x128xbf16>, vector<128x128xbf16>, vector<12x128xf32> -> vector<12x128xf32>
    %c1_39 = arith.constant 1 : index
    %c0_40 = arith.constant 0 : index
    %c0_41 = arith.constant 0 : index
    %60 = vector.load %arg5[%c1_39, %c0_40, %c0_41] : memref<2x1x128xf32, #tpu.memory_space<vmem>>, vector<1x1x128xf32>
    %61 = vector.shape_cast %60 : vector<1x1x128xf32> to vector<1x128xf32>
    %62 = vector.broadcast %61 : vector<1x128xf32> to vector<12x128xf32>
    %63 = arith.addf %59, %62 : vector<12x128xf32>
    %cst_42 = arith.constant 0.000000e+00 : f32
    %64 = vector.broadcast %cst_42 : f32 to vector<12x128xf32>
    %65 = arith.maximumf %63, %64 : vector<12x128xf32>
    %cst_43 = arith.constant dense<0.000000e+00> : vector<128xf32>
    %66 = vector.multi_reduction <add>, %65, %cst_43 [0] : vector<12x128xf32> to vector<128xf32>
    %67 = vector.shape_cast %66 : vector<128xf32> to vector<1x128xf32>
    %cst_44 = arith.constant 1.200000e+01 : f32
    %68 = vector.broadcast %cst_44 : f32 to vector<1x128xf32>
    %69 = arith.divf %67, %68 : vector<1x128xf32>
    %70 = arith.mulf %65, %65 : vector<12x128xf32>
    %cst_45 = arith.constant dense<0.000000e+00> : vector<128xf32>
    %71 = vector.multi_reduction <add>, %70, %cst_45 [0] : vector<12x128xf32> to vector<128xf32>
    %72 = vector.shape_cast %71 : vector<128xf32> to vector<1x128xf32>
    %cst_46 = arith.constant 1.200000e+01 : f32
    %73 = vector.broadcast %cst_46 : f32 to vector<1x128xf32>
    %74 = arith.divf %72, %73 : vector<1x128xf32>
    %75 = arith.mulf %69, %69 : vector<1x128xf32>
    %76 = arith.subf %74, %75 : vector<1x128xf32>
    %cst_47 = arith.constant 0.000000e+00 : f32
    %77 = vector.broadcast %cst_47 : f32 to vector<1x128xf32>
    %78 = arith.maximumf %76, %77 : vector<1x128xf32>
    %79 = vector.broadcast %69 : vector<1x128xf32> to vector<12x128xf32>
    %80 = arith.subf %65, %79 : vector<12x128xf32>
    %cst_48 = arith.constant 9.99999974E-6 : f32
    %81 = vector.broadcast %cst_48 : f32 to vector<1x128xf32>
    %82 = arith.addf %78, %81 : vector<1x128xf32>
    %83 = math.rsqrt %82 : vector<1x128xf32>
    %84 = vector.broadcast %83 : vector<1x128xf32> to vector<12x128xf32>
    %85 = arith.mulf %80, %84 : vector<12x128xf32>
    %c0_49 = arith.constant 0 : index
    %c128 = arith.constant 128 : index
    %86 = vector.load %arg25[%c0_49, %c128] : memref<12x256xf32, #tpu.memory_space<vmem>>, vector<12x128xf32>
    tpu.vector_store %arg25[%c0_49, %c128], %85 {strides = array<i32>} : memref<12x256xf32, #tpu.memory_space<vmem>>, vector<12x128xf32>,
    %c0_50 = arith.constant 0 : index
    %c0_51 = arith.constant 0 : index
    %87 = vector.load %arg25[%c0_50, %c0_51] : memref<12x256xf32, #tpu.memory_space<vmem>>, vector<12x256xf32>
    %c0_52 = arith.constant 0 : index
    %c0_53 = arith.constant 0 : index
    %88 = vector.load %arg6[%c0_52, %c0_53] : memref<3x12xbf16, #tpu.memory_space<vmem>>, vector<3x12xbf16>
    %89 = arith.truncf %87 : vector<12x256xf32> to vector<12x256xbf16>
    %cst_54 = arith.constant dense<0.000000e+00> : vector<3x256xf32>
    %90 = tpu.matmul %88, %89, %cst_54 {dimension_numbers = #tpu.dot_dimension_numbers<[1], [0], [0], [1], [0, 0, 1, 1], [], []>} : vector<3x12xbf16>, vector<12x256xbf16>, vector<3x256xf32> -> vector<3x256xf32>
    %c0_55 = arith.constant 0 : index
    %c0_56 = arith.constant 0 : index
    %91 = vector.load %arg8[%c0_55, %c0_56] : memref<256x128xbf16, #tpu.memory_space<vmem>>, vector<256x128xbf16>
    %92 = arith.truncf %87 : vector<12x256xf32> to vector<12x256xbf16>
    %cst_57 = arith.constant dense<0.000000e+00> : vector<12x128xf32>
    %93 = tpu.matmul %92, %91, %cst_57 {dimension_numbers = #tpu.dot_dimension_numbers<[1], [0], [0], [1], [0, 0, 1, 1], [], []>} : vector<12x256xbf16>, vector<256x128xbf16>, vector<12x128xf32> -> vector<12x128xf32>
    %c0_58 = arith.constant 0 : index
    %c0_59 = arith.constant 0 : index
    %94 = vector.load %arg9[%c0_58, %c0_59] : memref<1x128xf32, #tpu.memory_space<vmem>>, vector<1x128xf32>
    %95 = vector.broadcast %94 : vector<1x128xf32> to vector<12x128xf32>
    %96 = arith.addf %93, %95 : vector<12x128xf32>
    %cst_60 = arith.constant 0.000000e+00 : f32
    %97 = vector.broadcast %cst_60 : f32 to vector<12x128xf32>
    %98 = arith.maximumf %96, %97 : vector<12x128xf32>
    %c0_61 = arith.constant 0 : index
    %c0_62 = arith.constant 0 : index
    %99 = vector.load %arg10[%c0_61, %c0_62] : memref<128x128xbf16, #tpu.memory_space<vmem>>, vector<128x128xbf16>
    %100 = arith.truncf %98 : vector<12x128xf32> to vector<12x128xbf16>
    %cst_63 = arith.constant dense<0.000000e+00> : vector<12x128xf32>
    %101 = tpu.matmul %100, %99, %cst_63 {dimension_numbers = #tpu.dot_dimension_numbers<[1], [0], [0], [1], [0, 0, 1, 1], [], []>} : vector<12x128xbf16>, vector<128x128xbf16>, vector<12x128xf32> -> vector<12x128xf32>
    %c0_64 = arith.constant 0 : index
    %c0_65 = arith.constant 0 : index
    %102 = vector.load %arg11[%c0_64, %c0_65] : memref<1x128xf32, #tpu.memory_space<vmem>>, vector<1x128xf32>
    %103 = vector.broadcast %102 : vector<1x128xf32> to vector<12x128xf32>
    %104 = arith.addf %101, %103 : vector<12x128xf32>
    %cst_66 = arith.constant 0.000000e+00 : f32
    %105 = vector.broadcast %cst_66 : f32 to vector<12x128xf32>
    %106 = arith.maximumf %104, %105 : vector<12x128xf32>
    %c0_67 = arith.constant 0 : index
    %c0_68 = arith.constant 0 : index
    %107 = vector.load %arg12[%c0_67, %c0_68] : memref<128x128xbf16, #tpu.memory_space<vmem>>, vector<128x128xbf16>
    %108 = arith.truncf %106 : vector<12x128xf32> to vector<12x128xbf16>
    %cst_69 = arith.constant dense<0.000000e+00> : vector<12x128xf32>
    %109 = tpu.matmul %108, %107, %cst_69 {dimension_numbers = #tpu.dot_dimension_numbers<[1], [0], [0], [1], [0, 0, 1, 1], [], []>} : vector<12x128xbf16>, vector<128x128xbf16>, vector<12x128xf32> -> vector<12x128xf32>
    %c0_70 = arith.constant 0 : index
    %c0_71 = arith.constant 0 : index
    %110 = vector.load %arg13[%c0_70, %c0_71] : memref<1x128xf32, #tpu.memory_space<vmem>>, vector<1x128xf32>
    %111 = vector.broadcast %110 : vector<1x128xf32> to vector<12x128xf32>
    %112 = arith.addf %109, %111 : vector<12x128xf32>
    %cst_72 = arith.constant 0.000000e+00 : f32
    %113 = vector.broadcast %cst_72 : f32 to vector<12x128xf32>
    %114 = arith.maximumf %112, %113 : vector<12x128xf32>
    %c0_73 = arith.constant 0 : index
    %c0_74 = arith.constant 0 : index
    %115 = vector.load %arg14[%c0_73, %c0_74] : memref<256x128xbf16, #tpu.memory_space<vmem>>, vector<256x128xbf16>
    %116 = arith.truncf %87 : vector<12x256xf32> to vector<12x256xbf16>
    %cst_75 = arith.constant dense<0.000000e+00> : vector<12x128xf32>
    %117 = tpu.matmul %116, %115, %cst_75 {dimension_numbers = #tpu.dot_dimension_numbers<[1], [0], [0], [1], [0, 0, 1, 1], [], []>} : vector<12x256xbf16>, vector<256x128xbf16>, vector<12x128xf32> -> vector<12x128xf32>
    %118 = arith.addf %114, %117 : vector<12x128xf32>
    %c0_76 = arith.constant 0 : index
    %c0_77 = arith.constant 0 : index
    %119 = vector.load %arg15[%c0_76, %c0_77] : memref<1x128xf32, #tpu.memory_space<vmem>>, vector<1x128xf32>
    %120 = vector.broadcast %119 : vector<1x128xf32> to vector<12x128xf32>
    %121 = arith.addf %118, %120 : vector<12x128xf32>
    %c0_78 = arith.constant 0 : index
    %c0_79 = arith.constant 0 : index
    %122 = vector.load %arg16[%c0_78, %c0_79] : memref<256x128xbf16, #tpu.memory_space<vmem>>, vector<256x128xbf16>
    %123 = arith.truncf %90 : vector<3x256xf32> to vector<3x256xbf16>
    %cst_80 = arith.constant dense<0.000000e+00> : vector<3x128xf32>
    %124 = tpu.matmul %123, %122, %cst_80 {dimension_numbers = #tpu.dot_dimension_numbers<[1], [0], [0], [1], [0, 0, 1, 1], [], []>} : vector<3x256xbf16>, vector<256x128xbf16>, vector<3x128xf32> -> vector<3x128xf32>
    %c0_81 = arith.constant 0 : index
    %c0_82 = arith.constant 0 : index
    %125 = vector.load %arg17[%c0_81, %c0_82] : memref<1x128xf32, #tpu.memory_space<vmem>>, vector<1x128xf32>
    %126 = vector.broadcast %125 : vector<1x128xf32> to vector<3x128xf32>
    %127 = arith.addf %124, %126 : vector<3x128xf32>
    %cst_83 = arith.constant 0.000000e+00 : f32
    %128 = vector.broadcast %cst_83 : f32 to vector<3x128xf32>
    %129 = arith.maximumf %127, %128 : vector<3x128xf32>
    %c0_84 = arith.constant 0 : index
    %c0_85 = arith.constant 0 : index
    %130 = vector.load %arg18[%c0_84, %c0_85] : memref<128x128xbf16, #tpu.memory_space<vmem>>, vector<128x128xbf16>
    %131 = arith.truncf %129 : vector<3x128xf32> to vector<3x128xbf16>
    %cst_86 = arith.constant dense<0.000000e+00> : vector<3x128xf32>
    %132 = tpu.matmul %131, %130, %cst_86 {dimension_numbers = #tpu.dot_dimension_numbers<[1], [0], [0], [1], [0, 0, 1, 1], [], []>} : vector<3x128xbf16>, vector<128x128xbf16>, vector<3x128xf32> -> vector<3x128xf32>
    %c0_87 = arith.constant 0 : index
    %c0_88 = arith.constant 0 : index
    %133 = vector.load %arg19[%c0_87, %c0_88] : memref<1x128xf32, #tpu.memory_space<vmem>>, vector<1x128xf32>
    %134 = vector.broadcast %133 : vector<1x128xf32> to vector<3x128xf32>
    %135 = arith.addf %132, %134 : vector<3x128xf32>
    %cst_89 = arith.constant 0.000000e+00 : f32
    %136 = vector.broadcast %cst_89 : f32 to vector<3x128xf32>
    %137 = arith.maximumf %135, %136 : vector<3x128xf32>
    %c0_90 = arith.constant 0 : index
    %c0_91 = arith.constant 0 : index
    %138 = vector.load %arg20[%c0_90, %c0_91] : memref<128x128xbf16, #tpu.memory_space<vmem>>, vector<128x128xbf16>
    %139 = arith.truncf %137 : vector<3x128xf32> to vector<3x128xbf16>
    %cst_92 = arith.constant dense<0.000000e+00> : vector<3x128xf32>
    %140 = tpu.matmul %139, %138, %cst_92 {dimension_numbers = #tpu.dot_dimension_numbers<[1], [0], [0], [1], [0, 0, 1, 1], [], []>} : vector<3x128xbf16>, vector<128x128xbf16>, vector<3x128xf32> -> vector<3x128xf32>
    %c0_93 = arith.constant 0 : index
    %c0_94 = arith.constant 0 : index
    %141 = vector.load %arg21[%c0_93, %c0_94] : memref<1x128xf32, #tpu.memory_space<vmem>>, vector<1x128xf32>
    %142 = vector.broadcast %141 : vector<1x128xf32> to vector<3x128xf32>
    %143 = arith.addf %140, %142 : vector<3x128xf32>
    %cst_95 = arith.constant 0.000000e+00 : f32
    %144 = vector.broadcast %cst_95 : f32 to vector<3x128xf32>
    %145 = arith.maximumf %143, %144 : vector<3x128xf32>
    %c0_96 = arith.constant 0 : index
    %c0_97 = arith.constant 0 : index
    %146 = vector.load %arg22[%c0_96, %c0_97] : memref<256x128xbf16, #tpu.memory_space<vmem>>, vector<256x128xbf16>
    %147 = arith.truncf %90 : vector<3x256xf32> to vector<3x256xbf16>
    %cst_98 = arith.constant dense<0.000000e+00> : vector<3x128xf32>
    %148 = tpu.matmul %147, %146, %cst_98 {dimension_numbers = #tpu.dot_dimension_numbers<[1], [0], [0], [1], [0, 0, 1, 1], [], []>} : vector<3x256xbf16>, vector<256x128xbf16>, vector<3x128xf32> -> vector<3x128xf32>
    %149 = arith.addf %145, %148 : vector<3x128xf32>
    %c0_99 = arith.constant 0 : index
    %c0_100 = arith.constant 0 : index
    %150 = vector.load %arg23[%c0_99, %c0_100] : memref<1x128xf32, #tpu.memory_space<vmem>>, vector<1x128xf32>
    %151 = vector.broadcast %150 : vector<1x128xf32> to vector<3x128xf32>
    %152 = arith.addf %149, %151 : vector<3x128xf32>
    %153 = arith.truncf %121 : vector<12x128xf32> to vector<12x128xbf16>
    %154 = arith.truncf %152 : vector<3x128xf32> to vector<3x128xbf16>
    %cst_101 = arith.constant dense<0.000000e+00> : vector<12x3xf32>
    %155 = tpu.matmul %153, %154, %cst_101 {dimension_numbers = #tpu.dot_dimension_numbers<[1], [1], [0], [0], [0, 0, 1, 0], [], []>} : vector<12x128xbf16>, vector<3x128xbf16>, vector<12x3xf32> -> vector<12x3xf32>
    %c0_102 = arith.constant 0 : index
    %c0_103 = arith.constant 0 : index
    %156 = vector.load %arg7[%c0_102, %c0_103] : memref<12x3xf32, #tpu.memory_space<vmem>>, vector<12x3xf32>
    %157 = arith.mulf %155, %156 : vector<12x3xf32>
    %cst_104 = arith.constant 1.000000e+00 : f32
    %158 = vector.broadcast %cst_104 : f32 to vector<12x3xf32>
    %159 = arith.subf %158, %156 : vector<12x3xf32>
    %160 = arith.mulf %155, %159 : vector<12x3xf32>
    %cst_105 = arith.constant 0.000000e+00 : f32
    %161 = vector.broadcast %cst_105 : f32 to vector<12x3xf32>
    %162 = arith.subf %161, %157 : vector<12x3xf32>
    %cst_106 = arith.constant 0.000000e+00 : f32
    %163 = vector.broadcast %cst_106 : f32 to vector<12x3xf32>
    %164 = arith.maximumf %162, %163 : vector<12x3xf32>
    %165 = math.absf %162 : vector<12x3xf32>
    %cst_107 = arith.constant 0.000000e+00 : f32
    %166 = vector.broadcast %cst_107 : f32 to vector<12x3xf32>
    %167 = arith.subf %166, %165 : vector<12x3xf32>
    %168 = math.exp %167 : vector<12x3xf32>
    %169 = math.log1p %168 : vector<12x3xf32>
    %170 = arith.addf %164, %169 : vector<12x3xf32>
    %cst_108 = arith.constant 0.693147182 : f32
    %171 = vector.broadcast %cst_108 : f32 to vector<12x3xf32>
    %172 = arith.subf %171, %170 : vector<12x3xf32>
    %173 = vector.shape_cast %172 : vector<12x3xf32> to vector<1x12x3xf32>
    %cst_109 = arith.constant dense<0.000000e+00> : vector<1xf32>
    %174 = vector.multi_reduction <add>, %173, %cst_109 [1, 2] : vector<1x12x3xf32> to vector<1xf32>
    %175 = vector.shape_cast %174 : vector<1xf32> to vector<1x1x1xf32>
    %176 = vector.extract %175[0, 0, 0] : f32 from vector<1x1x1xf32>
    %cst_110 = arith.constant 1.200000e+01 : f32
    %177 = arith.divf %176, %cst_110 : f32
    %cst_111 = arith.constant 0.000000e+00 : f32
    %178 = vector.broadcast %cst_111 : f32 to vector<12x3xf32>
    %179 = arith.subf %178, %160 : vector<12x3xf32>
    %cst_112 = arith.constant 0.000000e+00 : f32
    %180 = vector.broadcast %cst_112 : f32 to vector<12x3xf32>
    %181 = arith.maximumf %179, %180 : vector<12x3xf32>
    %182 = math.absf %179 : vector<12x3xf32>
    %cst_113 = arith.constant 0.000000e+00 : f32
    %183 = vector.broadcast %cst_113 : f32 to vector<12x3xf32>
    %184 = arith.subf %183, %182 : vector<12x3xf32>
    %185 = math.exp %184 : vector<12x3xf32>
    %186 = math.log1p %185 : vector<12x3xf32>
    %187 = arith.addf %181, %186 : vector<12x3xf32>
    %188 = arith.addf %187, %160 : vector<12x3xf32>
    %cst_114 = arith.constant 0.693147182 : f32
    %189 = vector.broadcast %cst_114 : f32 to vector<12x3xf32>
    %190 = arith.subf %188, %189 : vector<12x3xf32>
    %191 = vector.shape_cast %190 : vector<12x3xf32> to vector<1x12x3xf32>
    %cst_115 = arith.constant dense<0.000000e+00> : vector<1xf32>
    %192 = vector.multi_reduction <add>, %191, %cst_115 [1, 2] : vector<1x12x3xf32> to vector<1xf32>
    %193 = vector.shape_cast %192 : vector<1xf32> to vector<1x1x1xf32>
    %194 = vector.extract %193[0, 0, 0] : f32 from vector<1x1x1xf32>
    %cst_116 = arith.constant 2.400000e+01 : f32
    %195 = arith.divf %194, %cst_116 : f32
    %196 = arith.subf %195, %177 : f32
    %c0_117 = arith.constant 0 : index
    %c0_118 = arith.constant 0 : index
    %197 = memref.load %arg24[%c0_117, %c0_118] : memref<1x1xf32, #tpu.memory_space<smem>>
    memref.store %196, %arg24[%c0_117, %c0_118] : memref<1x1xf32, #tpu.memory_space<smem>>
    return
  }
}

</mosaic_0001>

<bundles_post_ra>
// kernel: tpu_custom_call.1
= control target key start
LH: loop header
LB: loop body
LE: loop exit
PB: predicated region body
PF: predicated region fallthrough
CT: control target
= control target key end

     0   :  { %s3197_s0 = inlined_call_operand.vmem [shape: bf16[12,12], index: 0, kind: input, shape index: {}]   ;;  %s3198_s1 = inlined_call_operand.vmem [shape: bf16[12,128], index: 1, kind: input, shape index: {}]   ;;  %s3199_s2 = inlined_call_operand.hbm [shape: bf16[2,128,128], index: 2, kind: input, shape index: {}]   ;;  %s3200_s3 = inlined_call_operand.vmem [shape: f32[2,1,128], index: 3, kind: input, shape index: {}]   ;;  %s3201_s4 = inlined_call_operand.hbm [shape: bf16[2,128,128], index: 4, kind: input, shape index: {}]   ;;  %s3202_s5 = inlined_call_operand.vmem [shape: f32[2,1,128], index: 5, kind: input, shape index: {}]   ;;  %s3203_s6 = inlined_call_operand.vmem [shape: bf16[3,12], index: 6, kind: input, shape index: {}]   ;;  %s3204_s7 = inlined_call_operand.vmem [shape: f32[12,3], index: 7, kind: input, shape index: {}]   ;;  %s3205_s8 = inlined_call_operand.hbm [shape: bf16[256,128], index: 8, kind: input, shape index: {}]   ;;  %s3206_s9 = inlined_call_operand.vmem [shape: f32[1,128], index: 9, kind: input, shape index: {}]   ;;  %s3207_s10 = inlined_call_operand.hbm [shape: bf16[128,128], index: 10, kind: input, shape index: {}]   ;;  %s3208_s11 = inlined_call_operand.vmem [shape: f32[1,128], index: 11, kind: input, shape index: {}]   ;;  %s3209_s12 = inlined_call_operand.hbm [shape: bf16[128,128], index: 12, kind: input, shape index: {}]   ;;  %s3210_s13 = inlined_call_operand.vmem [shape: f32[1,128], index: 13, kind: input, shape index: {}]   ;;  %s3211_s14 = inlined_call_operand.hbm [shape: bf16[256,128], index: 14, kind: input, shape index: {}]   ;;  %s3212_s15 = inlined_call_operand.vmem [shape: f32[1,128], index: 15, kind: input, shape index: {}]   ;;  %s3213_s16 = inlined_call_operand.hbm [shape: bf16[256,128], index: 16, kind: input, shape index: {}]   ;;  %s3214_s17 = inlined_call_operand.vmem [shape: f32[1,128], index: 17, kind: input, shape index: {}]   ;;  %s3215_s18 = inlined_call_operand.hbm [shape: bf16[128,128], index: 18, kind: input, shape index: {}]   ;;  %s3216_s19 = inlined_call_operand.vmem [shape: f32[1,128], index: 19, kind: input, shape index: {}]   ;;  %s3217_s20 = inlined_call_operand.hbm [shape: bf16[128,128], index: 20, kind: input, shape index: {}]   ;;  %s3218_s21 = inlined_call_operand.vmem [shape: f32[1,128], index: 21, kind: input, shape index: {}]   ;;  %s3219_s22 = inlined_call_operand.hbm [shape: bf16[256,128], index: 22, kind: input, shape index: {}]   ;;  %s3220_s23 = inlined_call_operand.vmem [shape: f32[1,128], index: 23, kind: input, shape index: {}]   ;;  %s3221_s24 = inlined_call_operand.hbm [shape: f32[1,1], index: 24, kind: output, shape index: {}]  }
   0x1   :  { %3227 = sst [smem:[#allocation28_spill]] %s3197_s0 }
   0x2   :  { %3228 = sst [smem:[#allocation29_spill]] %s3198_s1 }
   0x3   :  { %3229 = sst [smem:[#allocation30_spill]] %s3199_s2 }
   0x4   :  { %3230 = sst [smem:[#allocation31_spill]] %s3200_s3 }
   0x5   :  { %3231 = sst [smem:[#allocation32_spill]] %s3201_s4 }
   0x6   :  { %3232 = sst [smem:[#allocation33_spill]] %s3202_s5 }
   0x7   :  { %3233 = sst [smem:[#allocation34_spill]] %s3203_s6 }
   0x8   :  { %3234 = sst [smem:[#allocation35_spill]] %s3204_s7 }
   0x9   :  { %3235 = sst [smem:[#allocation36_spill]] %s3205_s8 }
   0xa   :  { %29 = vsyncpa [#allocation4], 0 }
   0xb   :  { %30 = vsyncpa [#allocation7], 0 }
   0xc   :  { %31 = vsyncpa [#allocation10], 0 }
   0xd   :  { %32 = vsyncpa [#allocation13], 0 }
   0xe   :  { %33 = vsyncpa [#allocation16], 0 }
   0xf   :  { %34 = vsyncpa [#allocation19], 0 }
  0x10   :  { %35 = vsyncpa [#allocation5], 0  ;;  %s3236_s27 = sld [smem:[#allocation32_spill]]  ;;  %s2891_s6 = smov [#allocation6]  }
  0x11   :  { %s61_s2 = sshll.u32 %s2891_s6, 4  ;;  %s93_s7 = sshll.u32 %s3207_s10, 4  ;;  %s62_s2 = int_to_ptr.vmem [resolvable:$true] %s61_s2  ;;  %s94_s7 = int_to_ptr.hbm [resolvable:$true] %s93_s7 }
  0x12   :  { %s2892_s30 = smov 64   ;;  %s2893_s3 = smov 4  }
  0x13   :  { %s2894_s25 = smov [#allocation9]   ;;  %s123_s5 = sshll.u32 %s3211_s14, 4  ;;  %s124_s5 = int_to_ptr.hbm [resolvable:$true] %s123_s5 }
  0x14   :  { %s95_s8 = sshll.u32 %s2894_s25, 4  ;;  %s2895_s6 = smov [#allocation12]   ;;  %s96_s8 = int_to_ptr.vmem [resolvable:$true] %s95_s8 }
  0x15   :  { %101 = dma.hbm_to_vmem [thread:$0]  %s94_s7, 1024, %s96_s8, [#allocation10], %s2892_s30, %s2892_s30, %s2893_s3  }
  0x16   :  { %s59_s28 = sshll.u32 %s3236_s27, 4  ;;  %s153_s27 = sshll.u32 %s3215_s18, 4  ;;  %s60_s28 = int_to_ptr.hbm [resolvable:$true] %s59_s28  ;;  %s154_s27 = int_to_ptr.hbm [resolvable:$true] %s153_s27 }
  0x17   :  { %67 = dma.hbm_to_vmem [thread:$0]  %s60_s28, 2048, %s62_s2, [#allocation7], %s2892_s30, %s2892_s30, %s2893_s3  }
  0x18   :  { %s125_s29 = sshll.u32 %s2895_s6, 4  ;;  %s2896_s28 = smov [#allocation15]   ;;  %s126_s29 = int_to_ptr.vmem [resolvable:$true] %s125_s29 }
  0x19   :  { %131 = dma.hbm_to_vmem [thread:$0]  %s124_s5, 2048, %s126_s29, [#allocation13], %s2892_s30, %s2892_s30, %s2893_s3  }
  0x1a   :  { %s155_s14 = sshll.u32 %s2896_s28, 4  ;;  %s3237_s25 = sld [smem:[#allocation30_spill]]  ;;  %s156_s14 = int_to_ptr.vmem [resolvable:$true] %s155_s14 }
  0x1b   :  { %161 = dma.hbm_to_vmem [thread:$0]  %s154_s27, 1024, %s156_s14, [#allocation16], %s2892_s30, %s2892_s30, %s2893_s3  }
  0x1c   :  { %s3238_s8 = sld [smem:[#allocation36_spill]]  ;;  %s2897_s10 = smov [#allocation3]  }
  0x1d   :  { %s46_s26 = sshll.u32 %s2897_s10, 4  ;;  %s2898_s5 = smov [#allocation8]   ;;  %s47_s26 = int_to_ptr.vmem [resolvable:$true] %s46_s26 }
  0x1e   :  { %s80_s6 = sshll.u32 %s2898_s5, 4  ;;  %s108_s2 = sshll.u32 %s3209_s12, 4  ;;  %s81_s6 = int_to_ptr.vmem [resolvable:$true] %s80_s6  ;;  %s109_s2 = int_to_ptr.hbm [resolvable:$true] %s108_s2 }
  0x1f   :  { %s138_s0 = sshll.u32 %s3213_s16, 4  ;;  %s168_s10 = sshll.u32 %s3217_s20, 4  ;;  %s139_s0 = int_to_ptr.hbm [resolvable:$true] %s138_s0  ;;  %s169_s10 = int_to_ptr.hbm [resolvable:$true] %s168_s10 }
  0x20   :  { %s44_s4 = sshll.u32 %s3237_s25, 4  ;;  %s2899_s25 = smov [#allocation11]   ;;  %s45_s4 = int_to_ptr.hbm [resolvable:$true] %s44_s4 }
  0x21   :  { %52 = dma.hbm_to_vmem [thread:$0]  %s45_s4, 2048, %s47_s26, [#allocation4], %s2892_s30, %s2892_s30, %s2893_s3  }
  0x22   :  { %s78_s1 = sshll.u32 %s3238_s8, 4  ;;  %s110_s18 = sshll.u32 %s2899_s25, 4  ;;  %s79_s1 = int_to_ptr.hbm [resolvable:$true] %s78_s1  ;;  %s111_s18 = int_to_ptr.vmem [resolvable:$true] %s110_s18 }
  0x23   :  { %86 = dma.hbm_to_vmem [thread:$0]  %s79_s1, 2048, %s81_s6, [#allocation7], %s2892_s30, %s2892_s30, %s2893_s3  }
  0x24   :  { %116 = dma.hbm_to_vmem [thread:$0]  %s109_s2, 1024, %s111_s18, [#allocation10], %s2892_s30, %s2892_s30, %s2893_s3  }
  0x25   :  { %s2900_s4 = smov [#allocation14]   ;;  %s183_s26 = sshll.u32 %s3219_s22, 4  ;;  %s184_s26 = int_to_ptr.hbm [resolvable:$true] %s183_s26 }
  0x26   :  { %s140_s12 = sshll.u32 %s2900_s4, 4  ;;  %s2901_s5 = smov [#allocation17]   ;;  %s141_s12 = int_to_ptr.vmem [resolvable:$true] %s140_s12 }
  0x27   :  { %146 = dma.hbm_to_vmem [thread:$0]  %s139_s0, 2048, %s141_s12, [#allocation13], %s2892_s30, %s2892_s30, %s2893_s3  }
  0x28   :  { %s170_s6 = sshll.u32 %s2901_s5, 4  ;;  %s2902_s29 = smov [#allocation18]   ;;  %s171_s6 = int_to_ptr.vmem [resolvable:$true] %s170_s6 }
  0x29   :  { %176 = dma.hbm_to_vmem [thread:$0]  %s169_s10, 1024, %s171_s6, [#allocation16], %s2892_s30, %s2892_s30, %s2893_s3  }
  0x2a   :  { %s185_s20 = sshll.u32 %s2902_s29, 4  ;;  %s186_s20 = int_to_ptr.vmem [resolvable:$true] %s185_s20 }
  0x2b   :  { %191 = dma.hbm_to_vmem [thread:$0]  %s184_s26, 2048, %s186_s20, [#allocation19], %s2892_s30, %s2892_s30, %s2893_s3  }
  0x2c   :  { %2877 = dma.done.wait [#allocation4], 2048  }
  0x2d   :  { %2878 = vsyncadd [#allocation4], 4294965248 }
  0x2e   :  { %2879 = dma.done.wait [#allocation7], 4096  }
  0x2f   :  { %2880 = vsyncadd [#allocation7], 4294963200 }
  0x30   :  { %2881 = dma.done.wait [#allocation10], 2048  }
  0x31   :  { %2882 = vsyncadd [#allocation10], 4294965248 }
  0x32   :  { %2883 = dma.done.wait [#allocation13], 4096  }
  0x33   :  { %2884 = vsyncadd [#allocation13], 4294963200 }
  0x34   :  { %2885 = dma.done.wait [#allocation16], 2048  }
  0x35   :  { %2886 = vsyncadd [#allocation16], 4294965248 }
  0x36   :  { %2887 = dma.done.wait [#allocation19], 2048  }
  0x37   :  { %2888 = vsyncadd [#allocation19], 4294965248  ;;  %vm253_vm0 = vcmask 1045504   ;;  %s3239_s2 = sld [smem:[#allocation29_spill]]  ;;  %v2445_v5 = vld [vmem:[#allocation3 + $0x38] sm:$0xff]  ;;  %vm249_vm1 = vcmask 97280  }
  0x38   :  { %s3240_s0 = sld [smem:[#allocation28_spill]]  ;;  %340 = vmatpush.bf16.msra.mxu1 %v2445_v5  ;;  %v2444_v8 = vld [vmem:[#allocation3 + $0x30] sm:$0xff]  ;;  %v2443_v9 = vld [vmem:[#allocation3 + $0x28] sm:$0xff]  ;;  %v2442_v10 = vld [vmem:[#allocation3 + $0x20] sm:$0xff]  ;;  %v2903_v35 = vmov 12.0   ;;  %vm441_vm2 = vcmask 1043456  }
  0x39   :  { %v2441_v11 = vld [vmem:[#allocation3 + $0x18] sm:$0xff]  ;;  %v2440_v12 = vld [vmem:[#allocation3 + $0x10] sm:$0xff]  ;;  %v2439_v13 = vld [vmem:[#allocation3 + $0x8] sm:$0xff]  ;;  %s3241_s7 = sld [smem:[#allocation31_spill]]  ;;  %2601 = vrcp.f32 %v2903_v35  ;;  %vm1804_vm14 = vcmask 23552   ;;  %vm1806_vm15 = vcmask 19456  }
  0x3a   :  { %v2438_v14 = vld [vmem:[#allocation3] sm:$0xff]  ;;  %v2453_v15 = vld [vmem:[#allocation6 + $0x38] sm:$0xff]  ;;  %v2452_v16 = vld [vmem:[#allocation6 + $0x30] sm:$0xff]  ;;  %s3242_s16 = sld [smem:[#allocation33_spill]]  ;;  %s1892_s6 = sshll.u32 %s3221_s24, 4  ;;  %s1893_s6 = int_to_ptr.hbm [resolvable:$true] %s1892_s6 }
  0x3b   :  { %425 = vmatpush.bf16.msra.mxu2 %v2453_v15  ;;  %v2451_v17 = vld [vmem:[#allocation6 + $0x28] sm:$0xff]  ;;  %v2450_v18 = vld [vmem:[#allocation6 + $0x20] sm:$0xff]  ;;  %v2449_v22 = vld [vmem:[#allocation6 + $0x18] sm:$0xff]  ;;  %s3243_s22 = sld [smem:[#allocation34_spill]] }
  0x3c   :  { %341 = vmatpush.bf16.msra.mxu1 %v2444_v8  ;;  %v2448_v23 = vld [vmem:[#allocation6 + $0x10] sm:$0xff]  ;;  %v2447_v24 = vld [vmem:[#allocation6 + $0x8] sm:$0xff]  ;;  %v2446_v25 = vld [vmem:[#allocation6] sm:$0xff]  ;;  %s3244_s8 = sld [smem:[#allocation35_spill]] }
  0x3d   :  { %v1914_v0 = vld [vmem:[%s3239_s2] sm:$0xf]  ;;  %v2437_v1 = vld [vmem:[%s3239_s2] sm:$0x30]  ;;  %v2475_v35 = vld [vmem:[#allocation8 + $0x28] sm:$0xff]  ;;  %s2905_s2 = smov [#allocation20]  }
  0x3e   :  { %v1910_v2 = vld [vmem:[%s3240_s0] sm:$0xf]  ;;  %v1915_v3 = vor.u32 %v2437_v1, %v1914_v0  ;;  %v2436_v4 = vld [vmem:[%s3240_s0] sm:$0x30] }
  0x3f   :  { %v3104_v7 = vor.u32 %v2436_v4, %v1910_v2  ;;  %426 = vmatpush.bf16.msra.mxu2 %v2452_v16  ;;  %v2589_v27 = vld [vmem:[%s3241_s7] ss:$0 sm:$0xff]  ;;  %v2602_v37 = vpop.eup %2601 }
  0x40   :  { %v255_v6 = vsel %vm253_vm0, %v1915_v3, 0  ;;  %342 = vmatpush.bf16.msra.mxu1 %v2443_v9  ;;  %v2590_v36 = vld [vmem:[%s3242_s16] ss:$0 sm:$0xff]  ;;  %v451_v41 = vmul.f32 12.0, %v2602_v37  ;;  %vm455_vm3 = vweird.f32 %v2602_v37  ;;  %v2461_v9 = vld [vmem:[#allocation3 + $0x78] sm:$0xff] }
  0x41   :  { %264 = vmatpush.bf16.msra.mxu0 %v255_v6  ;;  %v2458_v15 = vld [vmem:[#allocation3 + $0x60] sm:$0xff] }
  0x42   :  { %v452_v45 = vsub.f32 1.0, %v451_v41 }
  0x43   :  { %427 = vmatpush.bf16.msra.mxu2 %v2451_v17 }
  0x44   :  { %1916 = vmatmul.msk.bf16.vlgmr.msra.gmra.mxu0 %vm249_vm1, %v3104_v7  ;;  %343 = vmatpush.bf16.msra.mxu1 %v2442_v10  ;;  %v453_v52 = vmul.f32 %v2602_v37, %v452_v45  ;;  %v2460_v10 = vld [vmem:[#allocation3 + $0x70] sm:$0xff] }
  0x45   :  { %578 = vmatpush.bf16.msrb.mxu0 %v2461_v9  ;;  %v2508_v45 = vld [vmem:[#allocation12 + $0x30] sm:$0xff]  ;;  %v2593_v9 = vld [vmem:[%s3242_s16 + $0x1] ss:$0 sm:$0xff] }
  0x46   :  { %v454_v57 = vadd.f32 %v2602_v37, %v453_v52  ;;  %v2504_v52 = vld [vmem:[#allocation12 + $0x10] sm:$0xff] }
  0x47   :  { %428 = vmatpush.bf16.msra.mxu2 %v2450_v18  ;;  %v2457_v18 = vld [vmem:[#allocation3 + $0x58] sm:$0xff] }
  0x48   :  { %344 = vmatpush.bf16.msra.mxu1 %v2441_v11  ;;  %v3116_v62 = vsel %vm455_vm3, %v2602_v37, %v454_v57  ;;  %v2473_v37 = vld [vmem:[#allocation8 + $0x18] sm:$0xff]  ;;  %v2463_v57 = vld [vmem:[#allocation6 + $0x48] sm:$0xff] }
  0x49   :  { %579 = vmatpush.bf16.msrb.mxu0 %v2460_v10  ;;  %v2482_v10 = vld [vmem:[#allocation8 + $0x60] sm:$0xff] }
  0x4b   :  { %429 = vmatpush.bf16.msra.mxu2 %v2449_v22 }
  0x4c   :  { %345 = vmatpush.bf16.msra.mxu1 %v2440_v12  ;;  %v2459_v12 = vld [vmem:[#allocation3 + $0x68] sm:$0xff] }
  0x4d   :  { %580 = vmatpush.bf16.msrb.mxu0 %v2459_v12  ;;  %v2481_v12 = vld [vmem:[#allocation8 + $0x58] sm:$0xff] }
  0x4f   :  { %430 = vmatpush.bf16.msra.mxu2 %v2448_v23 }
  0x50   :  { %346 = vmatpush.bf16.msra.mxu1 %v2439_v13 }
  0x51   :  { %581 = vmatpush.bf16.msrb.mxu0 %v2458_v15 }
  0x53   :  { %431 = vmatpush.bf16.msra.mxu2 %v2447_v24 }
  0x54   :  { %347 = vmatpush.bf16.msra.mxu1 %v2438_v14 }
  0x55   :  { %582 = vmatpush.bf16.msrb.mxu0 %v2457_v18 }
  0x57   :  { %432 = vmatpush.bf16.msra.mxu2 %v2446_v25  ;;  %v2456_v25 = vld [vmem:[#allocation3 + $0x50] sm:$0xff] }
  0x59   :  { %583 = vmatpush.bf16.msrb.mxu0 %v2456_v25 }
  0xc1   :  { %v266_v19 = vpop.f32.mrf.mxu0 }
  0xc9   :  { %v268_v20 = vpop.f32.mrf.mxu0 }
  0xca   :  { %v287_v21 = vpack.c.bf16 %v268_v20, %v266_v19 }
  0xcc   :  { %348 = vmatmul.bf16.vlgmr.msra.gmra.mxu1 %v287_v21 }
 0x149   :  { %v349_v26 = vpop.f32.mrf.mxu1 }
 0x14a   :  { %v350_v28 = vadd.f32 %v2589_v27, %v349_v26 }
 0x14c   :  { %v354_v31 = vmax.f32 %v350_v28, 0.0  ;;  %v2455_v28 = vld [vmem:[#allocation3 + $0x48] sm:$0xff] }
 0x14d   :  { %584 = vmatpush.bf16.msrb.mxu0 %v2455_v28  ;;  %v2478_v28 = vld [vmem:[#allocation8 + $0x40] sm:$0xff] }
 0x151   :  { %v351_v29 = vpop.f32.mrf.mxu1 }
 0x152   :  { %v352_v30 = vadd.f32 %v2589_v27, %v351_v29  ;;  %v2454_v29 = vld [vmem:[#allocation3 + $0x40] sm:$0xff] }
 0x153   :  { %585 = vmatpush.bf16.msrb.mxu0 %v2454_v29 }
 0x154   :  { %v355_v32 = vmax.f32 %v352_v30, 0.0  ;;  %v2477_v30 = vld [vmem:[#allocation8 + $0x38] sm:$0xff] }
 0x156   :  { %v372_v33 = vpack.c.bf16 %v355_v32, %v354_v31 }
 0x157   :  { %895 = vmatpush.bf16.msra.mxu0 %v2477_v30 }
 0x158   :  { %433 = vmatmul.bf16.vlgmr.msra.gmra.mxu2 %v372_v33 }
 0x1db   :  { %v434_v34 = vpop.f32.mrf.mxu2 }
 0x1dc   :  { %v435_v38 = vadd.f32 %v2590_v36, %v434_v34  ;;  %v2476_v34 = vld [vmem:[#allocation8 + $0x30] sm:$0xff] }
 0x1dd   :  { %896 = vmatpush.bf16.msra.mxu0 %v2476_v34 }
 0x1de   :  { %v439_v42 = vmax.f32 %v435_v38, 0.0  ;;  %v2472_v38 = vld [vmem:[#allocation8 + $0x10] sm:$0xff] }
 0x1e0   :  { %v458_v47 = vmul.f32 %v439_v42, %v439_v42 }
 0x1e1   :  { %897 = vmatpush.bf16.msra.mxu0 %v2475_v35 }
 0x1e3   :  { %v436_v39 = vpop.f32.mrf.mxu2 }
 0x1e4   :  { %v437_v40 = vadd.f32 %v2590_v36, %v436_v39  ;;  %v2474_v36 = vld [vmem:[#allocation8 + $0x20] sm:$0xff] }
 0x1e5   :  { %898 = vmatpush.bf16.msra.mxu0 %v2474_v36  ;;  %v2470_v39 = vld [vmem:[#allocation8] sm:$0xff]  ;;  %v2516_v36 = vld [vmem:[#allocation12 + $0x70] sm:$0xff] }
 0x1e6   :  { %v440_v43 = vmax.f32 %v437_v40, 0.0 }
 0x1e8   :  { %v442_v44 = vsel %vm441_vm2, %v440_v43, 0.0  ;;  %v459_v46 = vmul.f32 %v440_v43, %v440_v43 }
 0x1e9   :  { %v443_v48 = vadd.f32 %v442_v44, %v439_v42  ;;  %899 = vmatpush.bf16.msra.mxu0 %v2473_v37  ;;  %v2469_v44 = vld [vmem:[#allocation6 + $0x78] sm:$0xff] }
 0x1ea   :  { %v460_v49 = vsel %vm441_vm2, %v459_v46, 0.0  ;;  %v2468_v46 = vld [vmem:[#allocation6 + $0x70] sm:$0xff] }
 0x1eb   :  { %v444_v50 = vrot.slane %v443_v48, 4  ;;  %v461_v51 = vadd.f32 %v460_v49, %v458_v47  ;;  %v2507_v47 = vld [vmem:[#allocation12 + $0x28] sm:$0xff]  ;;  %v2506_v49 = vld [vmem:[#allocation12 + $0x20] sm:$0xff] }
 0x1ed   :  { %v445_v53 = vadd.f32 %v444_v50, %v443_v48  ;;  %v462_v54 = vrot.slane %v461_v51, 4  ;;  %900 = vmatpush.bf16.msra.mxu0 %v2472_v38  ;;  %v2467_v48 = vld [vmem:[#allocation6 + $0x68] sm:$0xff]  ;;  %v2466_v50 = vld [vmem:[#allocation6 + $0x60] sm:$0xff] }
 0x1ef   :  { %v446_v55 = vrot.slane %v445_v53, 2  ;;  %v463_v56 = vadd.f32 %v462_v54, %v461_v51  ;;  %v2505_v51 = vld [vmem:[#allocation12 + $0x18] sm:$0xff]  ;;  %v2502_v54 = vld [vmem:[#allocation12] sm:$0xff] }
 0x1f1   :  { %v447_v58 = vadd.f32 %v446_v55, %v445_v53  ;;  %v464_v59 = vrot.slane %v463_v56, 2  ;;  %v2503_v53 = vld [vmem:[#allocation12 + $0x8] sm:$0xff]  ;;  %v2465_v55 = vld [vmem:[#allocation6 + $0x58] sm:$0xff] }
 0x1f3   :  { %v448_v60 = vrot.slane %v447_v58, 1  ;;  %v465_v61 = vadd.f32 %v464_v59, %v463_v56  ;;  %v2464_v56 = vld [vmem:[#allocation6 + $0x50] sm:$0xff] }
 0x1f5   :  { %v449_v63 = vadd.f32 %v448_v60, %v447_v58  ;;  %v466_v0 = vrot.slane %v465_v61, 1  ;;  %v2462_v58 = vld [vmem:[#allocation6 + $0x40] sm:$0xff] }
 0x1f6   :  { %v2591_v60 = vld [vmem:[%s3241_s7 + $0x1] ss:$0 sm:$0xff] }
 0x1f7   :  { %v457_v1 = vmul.f32 %v3116_v62, %v449_v63  ;;  %v467_v2 = vadd.f32 %v466_v0, %v465_v61 }
 0x1f9   :  { %v469_v3 = vmul.f32 %v457_v1, %v457_v1  ;;  %v468_v4 = vmul.f32 %v467_v2, %v3116_v62  ;;  %v473_v20 = vsub.f32 %v440_v43, %v457_v1  ;;  %v472_v21 = vsub.f32 %v439_v42, %v457_v1  ;;  %v2509_v42 = vld [vmem:[#allocation12 + $0x38] sm:$0xff] }
 0x1fb   :  { %v470_v5 = vsub.f32 %v468_v4, %v469_v3  ;;  %v2485_v4 = vld [vmem:[#allocation8 + $0x78] sm:$0xff] }
 0x1fd   :  { %v471_v6 = vmax.f32 %v470_v5, 0.0  ;;  %v2484_v5 = vld [vmem:[#allocation8 + $0x70] sm:$0xff] }
 0x1ff   :  { %v474_v8 = vadd.f32 1e-05, %v471_v6  ;;  %v2483_v6 = vld [vmem:[#allocation8 + $0x68] sm:$0xff] }
 0x201   :  { %2603 = vrsqrt.f32 %v474_v8  ;;  %vm481_vm5 = vweird.f32 %v474_v8 }
 0x207   :  { %v2604_v11 = vpop.eup %2603 }
 0x208   :  { %v476_v13 = vmul.f32 %v2604_v11, %v474_v8  ;;  %vm482_vm4 = vweird.f32 %v2604_v11 }
 0x209   :  { %vm483_vm6 = vmor %vm481_vm5, %vm482_vm4 }
 0x20a   :  { %v477_v14 = vmul.f32 %v2604_v11, %v476_v13 }
 0x20c   :  { %v478_v16 = vmul.f32 0.5, %v477_v14 }
 0x20e   :  { %v479_v17 = vsub.f32 1.5, %v478_v16 }
 0x210   :  { %v480_v19 = vmul.f32 %v2604_v11, %v479_v17  ;;  %v2480_v17 = vld [vmem:[#allocation8 + $0x50] sm:$0xff] }
 0x212   :  { %v484_v22 = vsel %vm483_vm6, %v2604_v11, %v480_v19 }
 0x213   :  { %v485_v23 = vmul.f32 %v484_v22, %v472_v21  ;;  %v486_v24 = vmul.f32 %v484_v22, %v473_v20 }
 0x215   :  { %v489_v26 = vpack.c.bf16 %v486_v24, %v485_v23  ;;  %488 = vst [vmem:[#allocation2] sm:$0xf] %v486_v24 }
 0x217   :  { %v491_v27 = vsel %vm253_vm0, %v489_v26, 0 }
 0x218   :  { %500 = vmatpush.bf16.msra.mxu3 %v491_v27 }
 0x21b   :  { %1981 = vmatmul.msk.bf16.vlgmr.msra.gmra.mxu3 %vm249_vm1, %v3104_v7  ;;  %v2471_v7 = vld [vmem:[#allocation8 + $0x8] sm:$0xff] }
 0x21c   :  { %v723_v31 = vld [vmem:[#allocation2] sm:$0xf]  ;;  %901 = vmatpush.bf16.msra.mxu0 %v2471_v7  ;;  %665 = vmatpush.bf16.msrb.mxu3 %v2469_v44  ;;  %v2515_v7 = vld [vmem:[#allocation12 + $0x68] sm:$0xff] }
 0x21d   :  { %v726_v32 = vpack.c.bf16 %v723_v31, %v485_v23  ;;  %v2479_v23 = vld [vmem:[#allocation8 + $0x48] sm:$0xff]  ;;  %v2517_v31 = vld [vmem:[#allocation12 + $0x78] sm:$0xff] }
 0x21f   :  { %v732_v33 = vsel %vm253_vm0, %v726_v32, 0 }
 0x220   :  { %744 = vmatpush.bf16.msrb.mxu1 %v732_v33  ;;  %902 = vmatpush.bf16.msra.mxu0 %v2470_v39 }
 0x221   :  { %666 = vmatpush.bf16.msrb.mxu3 %v2468_v46 }
 0x225   :  { %667 = vmatpush.bf16.msrb.mxu3 %v2467_v48  ;;  %v2512_v48 = vld [vmem:[#allocation12 + $0x50] sm:$0xff] }
 0x229   :  { %668 = vmatpush.bf16.msrb.mxu3 %v2466_v50 }
 0x22d   :  { %669 = vmatpush.bf16.msrb.mxu3 %v2465_v55 }
 0x231   :  { %670 = vmatpush.bf16.msrb.mxu3 %v2464_v56 }
 0x235   :  { %671 = vmatpush.bf16.msrb.mxu3 %v2463_v57  ;;  %v725_v57 = vld [vmem:[%s3243_s22] sm:$0x3] }
 0x236   :  { %2048 = vmatmul.msk.bf16.vlgmr.msrb.gmra.mxu1 %vm249_vm1, %v725_v57 }
 0x239   :  { %672 = vmatpush.bf16.msrb.mxu3 %v2462_v58  ;;  %v2493_v58 = vld [vmem:[#allocation9 + $0x38] sm:$0xff] }
 0x23a   :  { %994 = vmatpush.bf16.msra.mxu1 %v2493_v58 }
 0x23d   :  { %909 = vmatpush.bf16.msra.mxu3 %v2485_v4 }
 0x241   :  { %910 = vmatpush.bf16.msra.mxu3 %v2484_v5 }
 0x245   :  { %911 = vmatpush.bf16.msra.mxu3 %v2483_v6 }
 0x249   :  { %912 = vmatpush.bf16.msra.mxu3 %v2482_v10  ;;  %v2487_v10 = vld [vmem:[#allocation9 + $0x8] sm:$0xff] }
 0x24d   :  { %913 = vmatpush.bf16.msra.mxu3 %v2481_v12  ;;  %v2525_v12 = vld [vmem:[#allocation14 + $0x38] sm:$0xff] }
 0x251   :  { %914 = vmatpush.bf16.msra.mxu3 %v2480_v17  ;;  %v2592_v17 = vld [vmem:[%s3206_s9] ss:$0 sm:$0xff] }
 0x255   :  { %915 = vmatpush.bf16.msra.mxu3 %v2479_v23  ;;  %v2500_v23 = vld [vmem:[#allocation11 + $0x30] sm:$0xff] }
 0x259   :  { %916 = vmatpush.bf16.msra.mxu3 %v2478_v28 }
 0x29e   :  { %v502_v40 = vpop.f32.mrf.mxu3 }
 0x2a6   :  { %v504_v41 = vpop.f32.mrf.mxu3 }
 0x2a7   :  { %v524_v43 = vpack.c.bf16 %v504_v41, %v502_v40 }
 0x2a9   :  { %586 = vmatmul.bf16.vlgmr.msrb.gmra.mxu0 %v524_v43  ;;  %v2514_v43 = vld [vmem:[#allocation12 + $0x60] sm:$0xff] }
 0x2aa   :  { %1223 = vmatpush.bf16.msrb.mxu0 %v2509_v42 }
 0x2ae   :  { %1224 = vmatpush.bf16.msrb.mxu0 %v2508_v45 }
 0x2b2   :  { %1225 = vmatpush.bf16.msrb.mxu0 %v2507_v47  ;;  %v2513_v47 = vld [vmem:[#allocation12 + $0x58] sm:$0xff] }
 0x2b6   :  { %1226 = vmatpush.bf16.msrb.mxu0 %v2506_v49  ;;  %v2511_v49 = vld [vmem:[#allocation12 + $0x48] sm:$0xff] }
 0x2b9   :  { %903 = vmatmul.bf16.vlgmr.msra.gmra.mxu0 %v726_v32 }
 0x2ba   :  { %1227 = vmatpush.bf16.msrb.mxu0 %v2505_v51 }
 0x2be   :  { %1228 = vmatpush.bf16.msrb.mxu0 %v2504_v52  ;;  %v2510_v52 = vld [vmem:[#allocation12 + $0x40] sm:$0xff] }
 0x2c2   :  { %1229 = vmatpush.bf16.msrb.mxu0 %v2503_v53 }
 0x2c6   :  { %1230 = vmatpush.bf16.msrb.mxu0 %v2502_v54 }
 0x2c9   :  { %1231 = vmatmul.bf16.vlgmr.msrb.gmra.mxu0 %v726_v32 }
 0x326   :  { %v587_v59 = vpop.f32.mrf.mxu0 }
 0x327   :  { %v588_v61 = vadd.f32 %v2591_v60, %v587_v59 }
 0x329   :  { %v592_v1 = vmax.f32 %v588_v61, 0.0 }
 0x32e   :  { %v589_v63 = vpop.f32.mrf.mxu0 }
 0x32f   :  { %v590_v0 = vadd.f32 %v2591_v60, %v589_v63  ;;  %v2492_v63 = vld [vmem:[#allocation9 + $0x30] sm:$0xff] }
 0x330   :  { %995 = vmatpush.bf16.msra.mxu1 %v2492_v63 }
 0x331   :  { %v593_v2 = vmax.f32 %v590_v0, 0.0 }
 0x333   :  { %v611_v3 = vpack.c.bf16 %v593_v2, %v592_v1  ;;  %v2491_v2 = vld [vmem:[#allocation9 + $0x28] sm:$0xff] }
 0x334   :  { %996 = vmatpush.bf16.msra.mxu1 %v2491_v2 }
 0x335   :  { %673 = vmatmul.bf16.vlgmr.msrb.gmra.mxu3 %v611_v3  ;;  %v2490_v3 = vld [vmem:[#allocation9 + $0x20] sm:$0xff] }
 0x336   :  { %1237 = vmatpush.bf16.msrb.mxu3 %v2517_v31 }
 0x338   :  { %997 = vmatpush.bf16.msra.mxu1 %v2490_v3 }
 0x33a   :  { %1238 = vmatpush.bf16.msrb.mxu3 %v2516_v36  ;;  %v2519_v36 = vld [vmem:[#allocation14 + $0x8] sm:$0xff] }
 0x33e   :  { %1239 = vmatpush.bf16.msrb.mxu3 %v2515_v7  ;;  %v2557_v7 = vld [vmem:[#allocation18 + $0x38] sm:$0xff] }
 0x342   :  { %1240 = vmatpush.bf16.msrb.mxu3 %v2514_v43  ;;  %v2494_v43 = vld [vmem:[#allocation11] sm:$0xff] }
 0x346   :  { %1241 = vmatpush.bf16.msrb.mxu3 %v2513_v47  ;;  %v2554_v47 = vld [vmem:[#allocation18 + $0x20] sm:$0xff] }
 0x34a   :  { %1242 = vmatpush.bf16.msrb.mxu3 %v2512_v48  ;;  %v2531_v48 = vld [vmem:[#allocation14 + $0x68] sm:$0xff] }
 0x34e   :  { %1243 = vmatpush.bf16.msrb.mxu3 %v2511_v49  ;;  %v2553_v49 = vld [vmem:[#allocation18 + $0x18] sm:$0xff] }
 0x352   :  { %1244 = vmatpush.bf16.msrb.mxu3 %v2510_v52  ;;  %v2551_v52 = vld [vmem:[#allocation18 + $0x8] sm:$0xff] }
 0x3b8   :  { %v674_v8 = vpop.f32.mrf.mxu3 }
 0x3b9   :  { %v675_v11 = vadd.f32 %v2593_v9, %v674_v8  ;;  %v2489_v8 = vld [vmem:[#allocation9 + $0x18] sm:$0xff] }
 0x3ba   :  { %998 = vmatpush.bf16.msra.mxu1 %v2489_v8 }
 0x3bb   :  { %v3130_v15 = vmax.f32 %v675_v11, 0.0  ;;  %v2486_v11 = vld [vmem:[#allocation9] sm:$0xff] }
 0x3bd   :  { %v690_v20 = vmul.f32 %v3130_v15, %v3130_v15 }
 0x3c0   :  { %v676_v13 = vpop.f32.mrf.mxu3 }
 0x3c1   :  { %v677_v14 = vadd.f32 %v2593_v9, %v676_v13  ;;  %v2488_v9 = vld [vmem:[#allocation9 + $0x10] sm:$0xff]  ;;  %v904_v13 = vpop.f32.mrf.mxu0 }
 0x3c2   :  { %999 = vmatpush.bf16.msra.mxu1 %v2488_v9  ;;  %v2541_v9 = vld [vmem:[#allocation15 + $0x38] sm:$0xff] }
 0x3c3   :  { %v3132_v16 = vmax.f32 %v677_v14, 0.0  ;;  %v2524_v14 = vld [vmem:[#allocation14 + $0x30] sm:$0xff]  ;;  %1489 = vmatpush.bf16.msra.mxu0 %v2541_v9 }
 0x3c5   :  { %v681_v18 = vsel %vm441_vm2, %v3132_v16, 0.0  ;;  %v691_v19 = vmul.f32 %v3132_v16, %v3132_v16 }
 0x3c6   :  { %v682_v21 = vadd.f32 %v681_v18, %v3130_v15  ;;  %1000 = vmatpush.bf16.msra.mxu1 %v2487_v10  ;;  %v2501_v18 = vld [vmem:[#allocation11 + $0x38] sm:$0xff]  ;;  %v2540_v10 = vld [vmem:[#allocation15 + $0x30] sm:$0xff] }
 0x3c7   :  { %v692_v22 = vsel %vm441_vm2, %v691_v19, 0.0  ;;  %v746_v19 = vpop.f32.mrf.mxu1  ;;  %1490 = vmatpush.bf16.msra.mxu0 %v2540_v10 }
 0x3c8   :  { %v683_v24 = vrot.slane %v682_v21, 4  ;;  %v693_v25 = vadd.f32 %v692_v22, %v690_v20  ;;  %v2522_v20 = vld [vmem:[#allocation14 + $0x20] sm:$0xff]  ;;  %v905_v22 = vadd.f32 %v2592_v17, %v904_v13 }
 0x3ca   :  { %v684_v26 = vadd.f32 %v683_v24, %v682_v21  ;;  %v694_v27 = vrot.slane %v693_v25, 4  ;;  %1001 = vmatpush.bf16.msra.mxu1 %v2486_v11  ;;  %v906_v21 = vpop.f32.mrf.mxu0  ;;  %v2563_v11 = vld [vmem:[#allocation18 + $0x68] sm:$0xff] }
 0x3cb   :  { %v907_v24 = vadd.f32 %v2592_v17, %v906_v21  ;;  %v2559_v17 = vld [vmem:[#allocation18 + $0x48] sm:$0xff] }
 0x3cc   :  { %v685_v29 = vrot.slane %v684_v26, 2  ;;  %v695_v30 = vadd.f32 %v694_v27, %v693_v25  ;;  %v2539_v21 = vld [vmem:[#allocation15 + $0x28] sm:$0xff] }
 0x3cd   :  { %1491 = vmatpush.bf16.msra.mxu0 %v2539_v21 }
 0x3ce   :  { %v686_v32 = vadd.f32 %v685_v29, %v684_v26  ;;  %v696_v33 = vrot.slane %v695_v30, 2  ;;  %1393 = vmatpush.bf16.msrb.mxu1 %v2525_v12  ;;  %v2521_v26 = vld [vmem:[#allocation14 + $0x18] sm:$0xff]  ;;  %v2499_v29 = vld [vmem:[#allocation11 + $0x28] sm:$0xff]  ;;  %v2562_v12 = vld [vmem:[#allocation18 + $0x60] sm:$0xff] }
 0x3d0   :  { %v687_v34 = vrot.slane %v686_v32, 1  ;;  %v697_v35 = vadd.f32 %v696_v33, %v695_v30  ;;  %v748_v30 = vpop.f32.mrf.mxu1  ;;  %v2520_v33 = vld [vmem:[#allocation14 + $0x10] sm:$0xff] }
 0x3d2   :  { %v688_v37 = vadd.f32 %v687_v34, %v686_v32  ;;  %v698_v38 = vrot.slane %v697_v35, 1  ;;  %1394 = vmatpush.bf16.msrb.mxu1 %v2524_v14 }
 0x3d4   :  { %v689_v39 = vmul.f32 %v688_v37, %v3116_v62  ;;  %v699_v40 = vadd.f32 %v698_v38, %v697_v35  ;;  %v2498_v35 = vld [vmem:[#allocation11 + $0x20] sm:$0xff]  ;;  %v2497_v37 = vld [vmem:[#allocation11 + $0x18] sm:$0xff] }
 0x3d5   :  { %v2518_v38 = vld [vmem:[#allocation14] sm:$0xff] }
 0x3d6   :  { %v700_v41 = vmul.f32 %v699_v40, %v3116_v62  ;;  %v701_v42 = vmul.f32 %v689_v39, %v689_v39  ;;  %v704_v59 = vsub.f32 %v3130_v15, %v689_v39  ;;  %v705_v60 = vsub.f32 %v3132_v16, %v689_v39  ;;  %v2523_v15 = vld [vmem:[#allocation14 + $0x28] sm:$0xff]  ;;  %v2496_v39 = vld [vmem:[#allocation11 + $0x10] sm:$0xff] }
 0x3d7   :  { %1395 = vmatpush.bf16.msrb.mxu1 %v2523_v15  ;;  %v2495_v40 = vld [vmem:[#allocation11 + $0x8] sm:$0xff]  ;;  %v2561_v15 = vld [vmem:[#allocation18 + $0x58] sm:$0xff] }
 0x3d8   :  { %v702_v44 = vsub.f32 %v700_v41, %v701_v42  ;;  %v2556_v41 = vld [vmem:[#allocation18 + $0x30] sm:$0xff]  ;;  %v1291_v42 = vpack.c.bf16 %v746_v19, %v746_v19 }
 0x3da   :  { %v703_v45 = vmax.f32 %v702_v44, 0.0  ;;  %v2533_v44 = vld [vmem:[#allocation14 + $0x78] sm:$0xff] }
 0x3db   :  { %1396 = vmatpush.bf16.msrb.mxu1 %v2522_v20 }
 0x3dc   :  { %v706_v46 = vadd.f32 1e-05, %v703_v45  ;;  %v2555_v45 = vld [vmem:[#allocation18 + $0x28] sm:$0xff] }
 0x3de   :  { %2605 = vrsqrt.f32 %v706_v46  ;;  %vm713_vm8 = vweird.f32 %v706_v46 }
 0x3df   :  { %1397 = vmatpush.bf16.msrb.mxu1 %v2521_v26  ;;  %v2534_v26 = vld [vmem:[#allocation15] sm:$0xff] }
 0x3e3   :  { %1398 = vmatpush.bf16.msrb.mxu1 %v2520_v33 }
 0x3e4   :  { %v2606_v50 = vpop.eup %2605 }
 0x3e5   :  { %v708_v51 = vmul.f32 %v2606_v50, %v706_v46  ;;  %vm714_vm7 = vweird.f32 %v2606_v50  ;;  %v2532_v46 = vld [vmem:[#allocation14 + $0x70] sm:$0xff] }
 0x3e6   :  { %vm715_vm9 = vmor %vm713_vm8, %vm714_vm7 }
 0x3e7   :  { %v709_v53 = vmul.f32 %v2606_v50, %v708_v51  ;;  %1399 = vmatpush.bf16.msrb.mxu1 %v2519_v36  ;;  %v2552_v51 = vld [vmem:[#allocation18 + $0x10] sm:$0xff] }
 0x3e9   :  { %v710_v54 = vmul.f32 0.5, %v709_v53  ;;  %v2550_v53 = vld [vmem:[#allocation18] sm:$0xff] }
 0x3eb   :  { %v711_v55 = vsub.f32 1.5, %v710_v54  ;;  %1400 = vmatpush.bf16.msrb.mxu1 %v2518_v38  ;;  %v2529_v54 = vld [vmem:[#allocation14 + $0x58] sm:$0xff] }
 0x3ed   :  { %v712_v56 = vmul.f32 %v2606_v50, %v711_v55  ;;  %v2528_v55 = vld [vmem:[#allocation14 + $0x50] sm:$0xff] }
 0x3ef   :  { %v716_v61 = vsel %vm715_vm9, %v2606_v50, %v712_v56  ;;  %v2530_v50 = vld [vmem:[#allocation14 + $0x60] sm:$0xff]  ;;  %v2527_v56 = vld [vmem:[#allocation14 + $0x48] sm:$0xff] }
 0x3f0   :  { %v717_v0 = vmul.f32 %v716_v61, %v704_v59  ;;  %v718_v1 = vmul.f32 %v716_v61, %v705_v60  ;;  %v2594_v61 = vld [vmem:[%s3208_s11] ss:$0 sm:$0xff] }
 0x3f2   :  { %720 = vst [vmem:[#allocation2 + $0x10] sm:$0xf] %v718_v1 }
 0x3f9   :  { %v724_v4 = vld [vmem:[#allocation2 + $0x10] sm:$0xf] }
 0x3fa   :  { %v727_v5 = vpack.c.bf16 %v724_v4, %v717_v0  ;;  %v2565_v4 = vld [vmem:[#allocation18 + $0x78] sm:$0xff] }
 0x3fc   :  { %917 = vmatmul.bf16.vlgmr.msra.gmra.mxu3 %v727_v5  ;;  %v735_v6 = vsel %vm253_vm0, %v727_v5, 0 }
 0x3fd   :  { %757 = vmatpush.bf16.msrb.mxu2 %v735_v6  ;;  %v2564_v6 = vld [vmem:[#allocation18 + $0x70] sm:$0xff] }
 0x400   :  { %2049 = vmatmul.msk.bf16.vlgmr.msrb.gmra.mxu2 %vm249_vm1, %v725_v57  ;;  %v2526_v57 = vld [vmem:[#allocation14 + $0x40] sm:$0xff] }
 0x401   :  { %1079 = vmatpush.bf16.msra.mxu2 %v2501_v18  ;;  %v2558_v18 = vld [vmem:[#allocation18 + $0x40] sm:$0xff] }
 0x405   :  { %1080 = vmatpush.bf16.msra.mxu2 %v2500_v23  ;;  %v2537_v23 = vld [vmem:[#allocation15 + $0x18] sm:$0xff] }
 0x409   :  { %1081 = vmatpush.bf16.msra.mxu2 %v2499_v29  ;;  %v1232_v29 = vpop.f32.mrf.mxu0 }
 0x40c   :  { %1245 = vmatmul.bf16.vlgmr.msrb.gmra.mxu3 %v727_v5 }
 0x40d   :  { %1082 = vmatpush.bf16.msra.mxu2 %v2498_v35  ;;  %v2549_v35 = vld [vmem:[#allocation17 + $0x38] sm:$0xff] }
 0x40e   :  { %1572 = vmatpush.bf16.msra.mxu3 %v2549_v35 }
 0x411   :  { %1083 = vmatpush.bf16.msra.mxu2 %v2497_v37  ;;  %v1234_v38 = vpop.f32.mrf.mxu0 }
 0x415   :  { %1084 = vmatpush.bf16.msra.mxu2 %v2496_v39 }
 0x419   :  { %1085 = vmatpush.bf16.msra.mxu2 %v2495_v40  ;;  %v2595_v40 = vld [vmem:[%s3214_s17] ss:$0 sm:$0xff] }
 0x41d   :  { %1086 = vmatpush.bf16.msra.mxu2 %v2494_v43 }
 0x421   :  { %1406 = vmatpush.bf16.msrb.mxu2 %v2533_v44 }
 0x425   :  { %1407 = vmatpush.bf16.msrb.mxu2 %v2532_v46 }
 0x429   :  { %1408 = vmatpush.bf16.msrb.mxu2 %v2531_v48 }
 0x42d   :  { %1409 = vmatpush.bf16.msrb.mxu2 %v2530_v50 }
 0x431   :  { %1410 = vmatpush.bf16.msrb.mxu2 %v2529_v54 }
 0x435   :  { %1411 = vmatpush.bf16.msrb.mxu2 %v2528_v55  ;;  %v2545_v55 = vld [vmem:[#allocation17 + $0x18] sm:$0xff] }
 0x439   :  { %1412 = vmatpush.bf16.msrb.mxu2 %v2527_v56 }
 0x43d   :  { %1413 = vmatpush.bf16.msrb.mxu2 %v2526_v57  ;;  %v2544_v57 = vld [vmem:[#allocation17 + $0x10] sm:$0xff] }
 0x47f   :  { %v918_v16 = vpop.f32.mrf.mxu3 }
 0x480   :  { %v919_v25 = vadd.f32 %v918_v16, %v905_v22  ;;  %v2560_v16 = vld [vmem:[#allocation18 + $0x50] sm:$0xff]  ;;  %v2538_v22 = vld [vmem:[#allocation15 + $0x20] sm:$0xff] }
 0x481   :  { %1492 = vmatpush.bf16.msra.mxu0 %v2538_v22 }
 0x482   :  { %v923_v31 = vmax.f32 %v919_v25, 0.0  ;;  %v2535_v25 = vld [vmem:[#allocation15 + $0x8] sm:$0xff] }
 0x483   :  { %v759_v58 = vpop.f32.mrf.mxu2 }
 0x484   :  { %v1292_v14 = vpack.c.bf16 %v759_v58, %v759_v58 }
 0x485   :  { %1493 = vmatpush.bf16.msra.mxu0 %v2537_v23 }
 0x487   :  { %v920_v27 = vpop.f32.mrf.mxu3 }
 0x488   :  { %v921_v28 = vadd.f32 %v920_v27, %v907_v24  ;;  %v2536_v24 = vld [vmem:[#allocation15 + $0x10] sm:$0xff] }
 0x489   :  { %1494 = vmatpush.bf16.msra.mxu0 %v2536_v24 }
 0x48a   :  { %v924_v32 = vmax.f32 %v921_v28, 0.0  ;;  %v2596_v28 = vld [vmem:[%s3210_s13] ss:$0 sm:$0xff] }
 0x48b   :  { %v761_v59 = vpop.f32.mrf.mxu2 }
 0x48c   :  { %v941_v34 = vpack.c.bf16 %v924_v32, %v923_v31 }
 0x48d   :  { %1495 = vmatpush.bf16.msra.mxu0 %v2535_v25 }
 0x48e   :  { %1002 = vmatmul.bf16.vlgmr.msra.gmra.mxu1 %v941_v34 }
 0x48f   :  { %1714 = vmatpush.bf16.msra.mxu1 %v2557_v7  ;;  %v1246_v27 = vpop.f32.mrf.mxu3  ;;  %v2548_v7 = vld [vmem:[#allocation17 + $0x30] sm:$0xff] }
 0x490   :  { %v1247_v36 = vadd.f32 %v1246_v27, %v1232_v29  ;;  %1573 = vmatpush.bf16.msra.mxu3 %v2548_v7 }
 0x491   :  { %1496 = vmatpush.bf16.msra.mxu0 %v2534_v26 }
 0x493   :  { %1715 = vmatpush.bf16.msra.mxu1 %v2556_v41 }
 0x497   :  { %1716 = vmatpush.bf16.msra.mxu1 %v2555_v45  ;;  %v1248_v33 = vpop.f32.mrf.mxu3  ;;  %v2547_v45 = vld [vmem:[#allocation17 + $0x28] sm:$0xff] }
 0x498   :  { %v1249_v39 = vadd.f32 %v1248_v33, %v1234_v38  ;;  %1574 = vmatpush.bf16.msra.mxu3 %v2547_v45 }
 0x49b   :  { %1717 = vmatpush.bf16.msra.mxu1 %v2554_v47 }
 0x49e   :  { %1401 = vmatmul.bf16.vlgmr.msrb.gmra.mxu1 %v1291_v42 }
 0x49f   :  { %1718 = vmatpush.bf16.msra.mxu1 %v2553_v49 }
 0x4a3   :  { %1719 = vmatpush.bf16.msra.mxu1 %v2552_v51 }
 0x4a7   :  { %1720 = vmatpush.bf16.msra.mxu1 %v2551_v52  ;;  %v2546_v52 = vld [vmem:[#allocation17 + $0x20] sm:$0xff] }
 0x4a8   :  { %1575 = vmatpush.bf16.msra.mxu3 %v2546_v52 }
 0x4ab   :  { %1721 = vmatpush.bf16.msra.mxu1 %v2550_v53 }
 0x4ac   :  { %1576 = vmatpush.bf16.msra.mxu3 %v2545_v55 }
 0x4ae   :  { %1722 = vmatmul.bf16.vlgmr.msra.gmra.mxu1 %v1291_v42  ;;  %v2597_v42 = vld [vmem:[%s3212_s15] ss:$0 sm:$0xff] }
 0x4b0   :  { %1577 = vmatpush.bf16.msra.mxu3 %v2544_v57 }
 0x50b   :  { %v1003_v60 = vpop.f32.mrf.mxu1 }
 0x50c   :  { %v1004_v63 = vadd.f32 %v2594_v61, %v1003_v60  ;;  %v2543_v60 = vld [vmem:[#allocation17 + $0x8] sm:$0xff] }
 0x50d   :  { %1578 = vmatpush.bf16.msra.mxu3 %v2543_v60 }
 0x50e   :  { %v1008_v2 = vmax.f32 %v1004_v63, 0.0  ;;  %v2598_v63 = vld [vmem:[%s3216_s19] ss:$0 sm:$0xff] }
 0x513   :  { %v1005_v0 = vpop.f32.mrf.mxu1 }
 0x514   :  { %v1006_v1 = vadd.f32 %v2594_v61, %v1005_v0  ;;  %v2542_v61 = vld [vmem:[#allocation17] sm:$0xff] }
 0x515   :  { %1579 = vmatpush.bf16.msra.mxu3 %v2542_v61 }
 0x516   :  { %v1009_v3 = vmax.f32 %v1006_v1, 0.0 }
 0x518   :  { %v1026_v5 = vpack.c.bf16 %v1009_v3, %v1008_v2 }
 0x51a   :  { %1087 = vmatmul.bf16.vlgmr.msra.gmra.mxu2 %v1026_v5  ;;  %v2599_v5 = vld [vmem:[%s3218_s21] ss:$0 sm:$0xff] }
 0x51b   :  { %1727 = vmatpush.bf16.msra.mxu2 %v2565_v4  ;;  %v1402_v8 = vpop.f32.mrf.mxu1 }
 0x51c   :  { %v1403_v46 = vadd.f32 %v2595_v40, %v1402_v8 }
 0x51f   :  { %1728 = vmatpush.bf16.msra.mxu2 %v2564_v6 }
 0x523   :  { %1729 = vmatpush.bf16.msra.mxu2 %v2563_v11  ;;  %v1404_v13 = vpop.f32.mrf.mxu1  ;;  %v2600_v11 = vld [vmem:[%s3220_s23] ss:$0 sm:$0xff] }
 0x527   :  { %1730 = vmatpush.bf16.msra.mxu2 %v2562_v12 }
 0x52a   :  { %1414 = vmatmul.bf16.vlgmr.msrb.gmra.mxu2 %v1292_v14 }
 0x52b   :  { %1731 = vmatpush.bf16.msra.mxu2 %v2561_v15  ;;  %v3158_v19 = vpop.f32.mrf.mxu1 }
 0x52f   :  { %1732 = vmatpush.bf16.msra.mxu2 %v2560_v16  ;;  %v1762_v16 = vld [vmem:[%s3244_s8] sm:$0xff] }
 0x533   :  { %1733 = vmatpush.bf16.msra.mxu2 %v2559_v17  ;;  %v1725_v20 = vpop.f32.mrf.mxu1  ;;  %v1766_v17 = vsub.f32 1.0, %v1762_v16 }
 0x537   :  { %1734 = vmatpush.bf16.msra.mxu2 %v2558_v18 }
 0x53a   :  { %1735 = vmatmul.bf16.vlgmr.msra.gmra.mxu2 %v1292_v14 }
 0x59d   :  { %v1088_v30 = vpop.f32.mrf.mxu2 }
 0x59e   :  { %v1089_v31 = vadd.f32 %v2596_v28, %v1088_v30 }
 0x5a0   :  { %v1093_v32 = vmax.f32 %v1089_v31, 0.0 }
 0x5a2   :  { %v1251_v41 = vadd.f32 %v1247_v36, %v1093_v32 }
 0x5a4   :  { %v1257_v47 = vadd.f32 %v2597_v42, %v1251_v41 }
 0x5a5   :  { %v1090_v34 = vpop.f32.mrf.mxu2 }
 0x5a6   :  { %v1091_v37 = vadd.f32 %v2596_v28, %v1090_v34 }
 0x5a8   :  { %v1094_v43 = vmax.f32 %v1091_v37, 0.0 }
 0x5aa   :  { %v1252_v44 = vadd.f32 %v1249_v39, %v1094_v43 }
 0x5ac   :  { %v1258_v48 = vadd.f32 %v2597_v42, %v1252_v44 }
 0x5ad   :  { %v1415_v49 = vpop.f32.mrf.mxu2 }
 0x5ae   :  { %v1746_v50 = vpack.c.bf16 %v1258_v48, %v1257_v47  ;;  %v1416_v51 = vadd.f32 %v1415_v49, %v1403_v46 }
 0x5b0   :  { %v1419_v53 = vmax.f32 %v1416_v51, 0.0 }
 0x5b2   :  { %v1436_v54 = vpack.c.bf16 %v1419_v53, %v1419_v53 }
 0x5b4   :  { %1497 = vmatmul.bf16.vlgmr.msra.gmra.mxu0 %v1436_v54 }
 0x5b5   :  { %v1417_v56 = vpop.f32.mrf.mxu2 }
 0x5bd   :  { %v1736_v58 = vpop.f32.mrf.mxu2 }
 0x5be   :  { %v1737_v9 = vadd.f32 %v1736_v58, %v3158_v19  ;;  %v1763_v19 = vld [vmem:[%s3244_s8 + $0x8] sm:$0xf] }
 0x5bf   :  { %v1767_v26 = vsub.f32 1.0, %v1763_v19 }
 0x5c5   :  { %v1738_v59 = vpop.f32.mrf.mxu2 }
 0x631   :  { %v1498_v0 = vpop.f32.mrf.mxu0 }
 0x632   :  { %v1499_v1 = vadd.f32 %v2598_v63, %v1498_v0 }
 0x634   :  { %v1502_v2 = vmax.f32 %v1499_v1, 0.0 }
 0x636   :  { %v1519_v3 = vpack.c.bf16 %v1502_v2, %v1502_v2 }
 0x638   :  { %1580 = vmatmul.bf16.vlgmr.msra.gmra.mxu3 %v1519_v3 }
 0x639   :  { %v1500_v4 = vpop.f32.mrf.mxu0 }
 0x6bb   :  { %v1581_v6 = vpop.f32.mrf.mxu3 }
 0x6bc   :  { %v1582_v8 = vadd.f32 %v2599_v5, %v1581_v6 }
 0x6be   :  { %v1585_v10 = vmax.f32 %v1582_v8, 0.0 }
 0x6c0   :  { %v1740_v12 = vadd.f32 %v1737_v9, %v1585_v10 }
 0x6c2   :  { %v1745_v13 = vadd.f32 %v2600_v11, %v1740_v12 }
 0x6c3   :  { %v1583_v14 = vpop.f32.mrf.mxu3 }
 0x6c4   :  { %v1747_v15 = vpack.c.bf16 %v1745_v13, %v1745_v13 }
 0x6c6   :  { %1755 = vmatpush.bf16.xpose.msrb.mxu0 %v1747_v15 }
 0x6cd   :  { %1756 = vmatmul.bf16.vlgmr.msrb.gmra.mxu0 %v1746_v50 }
 0x74a   :  { %v1757_v18 = vpop.f32.mrf.mxu0 }
 0x74b   :  { %v1764_v20 = vmul.f32 %v1762_v16, %v1757_v18  ;;  %v3182_v21 = vmul.f32 %v1766_v17, %v1757_v18 }
 0x74d   :  { %v1770_v22 = vsub.f32 0.0, %v1764_v20  ;;  %v1827_v23 = vsub.f32 0.0, %v3182_v21 }
 0x74f   :  { %v1774_v24 = vand.u32 2147483647, %v1770_v22  ;;  %v1831_v25 = vand.u32 2147483647, %v1827_v23  ;;  %v1772_v1 = vmax.f32 %v1770_v22, 0.0  ;;  %v1829_v10 = vmax.f32 %v1827_v23, 0.0 }
 0x751   :  { %v1776_v27 = vsub.f32 0.0, %v1774_v24  ;;  %v1833_v28 = vsub.f32 0.0, %v1831_v25 }
 0x752   :  { %v1759_v29 = vpop.f32.mrf.mxu0 }
 0x753   :  { %v1778_v30 = vmul.f32 1.442695, %v1776_v27  ;;  %v1835_v31 = vmul.f32 1.442695, %v1833_v28  ;;  %v1765_v32 = vmul.f32 %v1763_v19, %v1759_v29  ;;  %v3188_v33 = vmul.f32 %v1767_v26, %v1759_v29 }
 0x755   :  { %2607 = vpow2.f32 %v1778_v30  ;;  %v1771_v34 = vsub.f32 0.0, %v1765_v32  ;;  %v1828_v35 = vsub.f32 0.0, %v3188_v33 }
 0x756   :  { %2609 = vpow2.f32 %v1835_v31 }
 0x757   :  { %v1775_v36 = vand.u32 2147483647, %v1771_v34  ;;  %v1832_v37 = vand.u32 2147483647, %v1828_v35  ;;  %v1773_v14 = vmax.f32 %v1771_v34, 0.0  ;;  %v1830_v17 = vmax.f32 %v1828_v35, 0.0 }
 0x759   :  { %v1777_v38 = vsub.f32 0.0, %v1775_v36  ;;  %v1834_v7 = vsub.f32 0.0, %v1832_v37  ;;  %v2904_v37 = vmov 24.0  }
 0x75b   :  { %v2608_v39 = vpop.eup %2607  ;;  %v1780_v40 = vmul.f32 1.442695, %v1777_v38  ;;  %v1837_v41 = vmul.f32 1.442695, %v1834_v7 }
 0x75c   :  { %v2610_v42 = vpop.eup %2609  ;;  %v1782_v43 = vadd.f32 1.0, %v2608_v39  ;;  %v1785_v45 = vmul.f32 -0.5, %v2608_v39  ;;  %v1788_v50 = vand.u32 2147483647, %v2608_v39 }
 0x75d   :  { %v1839_v44 = vadd.f32 1.0, %v2610_v42  ;;  %2611 = vpow2.f32 %v1780_v40  ;;  %v1842_v47 = vmul.f32 -0.5, %v2610_v42  ;;  %v1845_v60 = vand.u32 2147483647, %v2610_v42 }
 0x75e   :  { %2613 = vpow2.f32 %v1837_v41  ;;  %v1786_v48 = vadd.f32 1.0, %v1785_v45  ;;  %vm1789_vm10 = vcmp.lt.f32.partialorder %v1788_v50, 0.0004427343 }
 0x75f   :  { %2615 = vlog2.f32 %v1839_v44  ;;  %v1843_v57 = vadd.f32 1.0, %v1842_v47  ;;  %vm1846_vm11 = vcmp.lt.f32.partialorder %v1845_v60, 0.0004427343 }
 0x760   :  { %2617 = vlog2.f32 %v1782_v43  ;;  %v1787_v59 = vmul.f32 %v2608_v39, %v1786_v48 }
 0x761   :  { %v1844_v4 = vmul.f32 %v2610_v42, %v1843_v57 }
 0x763   :  { %v2612_v46 = vpop.eup %2611 }
 0x764   :  { %v2614_v49 = vpop.eup %2613  ;;  %v1791_v51 = vadd.f32 1.0, %v2612_v46  ;;  %v1794_v54 = vmul.f32 -0.5, %v2612_v46  ;;  %v1797_v3 = vand.u32 2147483647, %v2612_v46 }
 0x765   :  { %v2616_v52 = vpop.eup %2615  ;;  %v1848_v53 = vadd.f32 1.0, %v2614_v49  ;;  %v1851_v56 = vmul.f32 -0.5, %v2614_v49  ;;  %v1854_v5 = vand.u32 2147483647, %v2614_v49 }
 0x766   :  { %v2618_v55 = vpop.eup %2617  ;;  %2619 = vlog2.f32 %v1791_v51  ;;  %v1841_v61 = vmul.f32 0.6931472, %v2616_v52  ;;  %v1795_v0 = vadd.f32 1.0, %v1794_v54  ;;  %vm1798_vm12 = vcmp.lt.f32.partialorder %v1797_v3, 0.0004427343 }
 0x767   :  { %2621 = vlog2.f32 %v1848_v53  ;;  %v1784_v58 = vmul.f32 0.6931472, %v2618_v55  ;;  %v1852_v2 = vadd.f32 1.0, %v1851_v56  ;;  %vm1855_vm13 = vcmp.lt.f32.partialorder %v1854_v5, 0.0004427343 }
 0x768   :  { %v1847_v11 = vsel %vm1846_vm11, %v1844_v4, %v1841_v61  ;;  %v1796_v13 = vmul.f32 %v2612_v46, %v1795_v0  ;;  %2623 = vrcp.f32 %v2904_v37 }
 0x769   :  { %v1790_v63 = vsel %vm1789_vm10, %v1787_v59, %v1784_v58  ;;  %v1853_v16 = vmul.f32 %v2614_v49, %v1852_v2  ;;  %v1857_v20 = vadd.f32 %v1847_v11, %v1829_v10 }
 0x76a   :  { %v1800_v8 = vadd.f32 %v1790_v63, %v1772_v1 }
 0x76b   :  { %v1859_v27 = vadd.f32 %v1857_v20, %v3182_v21 }
 0x76c   :  { %v2620_v6 = vpop.eup %2619  ;;  %v1802_v24 = vsub.f32 0.6931472, %v1800_v8 }
 0x76d   :  { %v2622_v9 = vpop.eup %2621  ;;  %v1793_v12 = vmul.f32 0.6931472, %v2620_v6  ;;  %v2434_v32 = vadd.f32 -0.6931472, %v1859_v27 }
 0x76e   :  { %v1850_v15 = vmul.f32 0.6931472, %v2622_v9  ;;  %v1805_v28 = vsel %vm1804_vm14, %v1802_v24, 0.0  ;;  %v2624_v38 = vpop.eup %2623 }
 0x76f   :  { %v1799_v18 = vsel %vm1798_vm12, %v1796_v13, %v1793_v12  ;;  %v1863_v35 = vsel %vm1804_vm14, %v2434_v32, 0.0  ;;  %v1876_v41 = vmul.f32 24.0, %v2624_v38  ;;  %vm1880_vm0 = vweird.f32 %v2624_v38 }
 0x770   :  { %v1856_v19 = vsel %vm1855_vm13, %v1853_v16, %v1850_v15  ;;  %v1801_v22 = vadd.f32 %v1799_v18, %v1773_v14 }
 0x771   :  { %v1858_v25 = vadd.f32 %v1856_v19, %v1830_v17  ;;  %v1877_v21 = vsub.f32 1.0, %v1876_v41 }
 0x772   :  { %v1803_v26 = vsub.f32 0.6931472, %v1801_v22 }
 0x773   :  { %v1860_v23 = vadd.f32 %v1858_v25, %v3188_v33  ;;  %v1878_v48 = vmul.f32 %v2624_v38, %v1877_v21 }
 0x774   :  { %v1807_v29 = vsel %vm1806_vm15, %v1803_v26, 0.0 }
 0x775   :  { %v1808_v30 = vadd.f32 %v1807_v29, %v1805_v28  ;;  %v2435_v31 = vadd.f32 -0.6931472, %v1860_v23  ;;  %v1879_v51 = vadd.f32 %v2624_v38, %v1878_v48 }
 0x777   :  { %1809 = vadd.xlane.f32.xlu0 %v1808_v30  ;;  %v1864_v34 = vsel %vm1806_vm15, %v2435_v31, 0.0  ;;  %v1881_v54 = vsel %vm1880_vm0, %v2624_v38, %v1879_v51 }
 0x778   :  { %v1865_v36 = vadd.f32 %v1864_v34, %v1863_v35 }
 0x77f   :  { %1866 = vadd.xlane.f32.xlu0 %v1865_v36 }
 0x7ea   :  { %v1810_v7 = vpop.xlane.xlu0 %1809 }
 0x7eb   :  { %v1811_v39 = vrot.slane %v1810_v7, 4 }
 0x7ed   :  { %v1812_v40 = vadd.f32 %v1811_v39, %v1810_v7 }
 0x7ef   :  { %v1813_v33 = vrot.slane %v1812_v40, 2 }
 0x7f1   :  { %v1814_v42 = vadd.f32 %v1813_v33, %v1812_v40 }
 0x7f2   :  { %v1867_v43 = vpop.xlane.xlu0 %1866 }
 0x7f3   :  { %v1868_v44 = vrot.slane %v1867_v43, 4  ;;  %v1815_v45 = vrot.slane %v1814_v42, 1 }
 0x7f5   :  { %v1869_v46 = vadd.f32 %v1868_v44, %v1867_v43  ;;  %v1816_v47 = vadd.f32 %v1815_v45, %v1814_v42 }
 0x7f7   :  { %v1870_v49 = vrot.slane %v1869_v46, 2  ;;  %2566 = vpush %v1816_v47 }
 0x7f8   :  { %2568 = vpush %v3116_v62 }
 0x7f9   :  { %v1871_v50 = vadd.f32 %v1870_v49, %v1869_v46 }
 0x7fb   :  { %v1872_v52 = vrot.slane %v1871_v50, 1 }
 0x7fd   :  { %v1873_v53 = vadd.f32 %v1872_v52, %v1871_v50 }
 0x7ff   :  { %2570 = vpush %v1873_v53 }
 0x800   :  { %2572 = vpush %v1881_v54 }
 0x828   :  { %s2567_s23 = spop %2566 }
 0x829   :  { %s2569_s16 = spop %2568 }
 0x82a   :  { %s1826_s29 = smul.f32 %s2569_s16, %s2567_s23 }
 0x830   :  { %s2571_s1 = spop %2570 }
 0x831   :  { %s2573_s20 = spop %2572 }
 0x832   :  { %s1883_s22 = smul.f32 %s2573_s20, %s2571_s1 }
 0x834   :  { %s1884_s28 = ssub.f32 %s1883_s22, %s1826_s29 }
 0x836   :  { %1886 = sst [smem:[#allocation20]] %s1884_s28 }
 0x837   :  { %1895 = dma.smem_to_hbm %s2905_s2, 16, %s1893_s6, [#allocation5]  }
 0x838   :  { %2889 = dma.done.wait [#allocation5], 16  }
 0x839   :  { %2890 = vsyncadd [#allocation5], 4294967280 }
 0x83a   :  { %1900 = sfence }
 0x83b   :  { %1901 = vsyncpa [#allocation4], 1 }
 0x83c   :  { %1902 = vsyncpa [#allocation7], 1 }
 0x83d   :  { %1903 = vsyncpa [#allocation10], 1 }
 0x83e   :  { %1904 = vsyncpa [#allocation13], 1 }
 0x83f   :  { %1905 = vsyncpa [#allocation16], 1 }
 0x840   :  { %1906 = vsyncpa [#allocation19], 1 }
 0x841   :  { %1907 = vsyncpa [#allocation5], 1 }

</bundles_post_ra>
